<compile_context>
chip_gen: v6e
topology: v6e:2x2x1
jax: 0.10.0
libtpu: 0.0.40
codegen_flags: <defaults>
</compile_context>

<pallas_src>
import jax
import jax.numpy as jnp
from jax import lax
from jax.experimental import pallas as pl
from jax.experimental.pallas import tpu as pltpu

EPS = 1e-5


def _cdiv(a, b):
    return (a + b - 1) // b


def _round_up(x, m):
    return ((x + m - 1) // m) * m


def _discriminator_kernel(x_ref, w1_ref, rl_ref, g_ref, b_ref, b2_ref, o_ref):
    # x : (D+1, tile_n) f32  -- samples along lanes; last row is ones (b1 fold)
    # w1: (H, D+1)    f32    -- W1^T with b1 appended as its last column
    # rl: (2, H)      f32    -- row 0: ones (LayerNorm sums), row 1: W2^T
    # g : (H, 1)      f32    -- LayerNorm gamma (column)
    # b : (H, 1)      f32    -- LayerNorm beta  (column)
    # b2: (1, 1)      f32
    # o : (1, tile_n) f32    -- lane-dense output row

    # Linear-1 (+ bias, + the series/adm concat) as one f32 MXU matmul.
    h = jnp.dot(w1_ref[...], x_ref[...],
                preferred_element_type=jnp.float32)              # (H, tile_n)

    # Dropout(0.5): identity at inference time.
    # TODO(synk): training-mode dropout (pltpu.prng_random_bits masking) not implemented.

    hidden = h.shape[0]
    ones_row = rl_ref[0:1, :]                                     # (1, H)
    w2_row = rl_ref[1:2, :]                                       # (1, H)

    # Single-pass LayerNorm stats; column reductions on the otherwise-idle MXU.
    s1 = jnp.dot(ones_row, h, preferred_element_type=jnp.float32)      # (1, tile_n)
    s2 = jnp.dot(ones_row, h * h, preferred_element_type=jnp.float32)  # (1, tile_n)
    mean = s1 * (1.0 / hidden)
    var = s2 * (1.0 / hidden) - mean * mean
    inv = lax.rsqrt(var + EPS)                                    # EUP rsqrt

    # LayerNorm affine + ReLU (VPU; broadcasts are (1,tile_n) and (H,1)).
    hn = (h - mean) * inv * g_ref[...] + b_ref[...]
    hr = jnp.maximum(hn, 0.0)

    # Linear-2 (H -> 1) as a (1,H)@(H,tile_n) MXU matvec: result is already a
    # lane-dense (1, tile_n) row.
    o_ref[...] = jnp.dot(w2_row, hr,
                         preferred_element_type=jnp.float32) + b2_ref[...]


def _pick_tiling(n, max_tile_n):
    """Balanced batch tiles.

    With more than one tile the sample axis is the lane axis of the input
    block, so tile_n must be a multiple of 128; with a single tile the block
    spans the full padded array and only 8-row alignment is needed.
    """
    n_tiles = _cdiv(n, max_tile_n)
    if n >= 512:                 # enough rows to keep both v7x TensorCores busy
        n_tiles = max(n_tiles, 2)
    if n_tiles == 1:
        tile_n = _round_up(n, 8)
    else:
        tile_n = _round_up(_cdiv(n, n_tiles), 128)
    return n_tiles, tile_n


def discriminator_forward(series, adm, params, *, max_tile_n=1024):
    """series: (N, L, series_dim) f32, adm: (N, adm_dim) f32 -> (N, 1) f32."""
    N = series.shape[0]
    series_flat = series.reshape(N, -1)                           # free reshape
    w1, b1, gamma, beta, w2, b2 = params
    d_in, H = w1.shape
    assert series_flat.shape[1] + adm.shape[1] == d_in
    assert w2.shape == (H, 1)

    # Fold the concat AND b1 into one matmul:
    #   x_aug = [series_flat | adm | 1],  W1_aug = [[W1], [b1]].
    x_aug = jnp.concatenate(
        [series_flat, adm, jnp.ones((N, 1), jnp.float32)],
        axis=-1).astype(jnp.float32)                              # (N, D+1)
    w1_aug_t = jnp.concatenate(
        [w1, b1.reshape(1, H)], axis=0).astype(jnp.float32).T     # (H, D+1)
    reduce_lhs = jnp.concatenate(
        [jnp.ones((1, H), jnp.float32),
         w2.reshape(1, H).astype(jnp.float32)], axis=0)           # (2, H)
    gamma_col = gamma.reshape(H, 1).astype(jnp.float32)
    beta_col = beta.reshape(H, 1).astype(jnp.float32)
    b2_arr = b2.reshape(1, 1).astype(jnp.float32)

    n_tiles, tile_n = _pick_tiling(N, max_tile_n)
    n_pad = n_tiles * tile_n
    if n_pad != N:
        x_aug = jnp.pad(x_aug, ((0, n_pad - N), (0, 0)))
    x_t = x_aug.T                                                  # (D+1, n_pad)
    d1 = d_in + 1

    out = pl.pallas_call(
        _discriminator_kernel,
        out_shape=jax.ShapeDtypeStruct((1, n_pad), jnp.float32),
        grid=(n_tiles,),
        in_specs=[
            pl.BlockSpec((d1, tile_n), lambda i: (0, i)),    # x^T tile
            pl.BlockSpec((H, d1), lambda i: (0, 0)),         # W1^T (+b1), resident
            pl.BlockSpec((2, H), lambda i: (0, 0)),          # [ones; W2^T], resident
            pl.BlockSpec((H, 1), lambda i: (0, 0)),          # gamma
            pl.BlockSpec((H, 1), lambda i: (0, 0)),          # beta
            pl.BlockSpec((1, 1), lambda i: (0, 0)),          # b2
        ],
        out_specs=pl.BlockSpec((1, tile_n), lambda i: (0, i)),
        compiler_params=pltpu.CompilerParams(
            dimension_semantics=("parallel",),
            vmem_limit_bytes=32 * 1024 * 1024),
    )(x_t, w1_aug_t, reduce_lhs, gamma_col, beta_col, b2_arr)

    return out[0, :N].reshape(N, 1)


def init_params(key, input_dim, hidden_size=512, output_dim=1):
    """Init mirroring PositionWiseFFN.init_weight (weights ~ U(-0.1, 0.1))."""
    k1, k2, k3, k4, k5, k6 = jax.random.split(key, 6)
    w1 = jax.random.uniform(k1, (input_dim, hidden_size), jnp.float32, -0.1, 0.1)
    b1 = jax.random.uniform(k2, (1, hidden_size), jnp.float32, -0.1, 0.1)
    gamma = 1.0 + 0.1 * jax.random.normal(k3, (1, hidden_size), jnp.float32)
    beta = 0.1 * jax.random.normal(k4, (1, hidden_size), jnp.float32)
    w2 = jax.random.uniform(k5, (hidden_size, output_dim), jnp.float32, -0.1, 0.1)
    b2 = jax.random.uniform(k6, (1, output_dim), jnp.float32, -0.1, 0.1)
    return (w1, b1, gamma, beta, w2, b2)


if __name__ == "__main__":
    # Small shapes consistent with the module.
    N = 2
    series_dim = 4
    series_length = 8
    adm_dim = 4
    hidden_size = 512
    input_dim = series_dim * series_length + adm_dim  # 36

    key = jax.random.PRNGKey(0)
    k_series, k_adm, k_params = jax.random.split(key, 3)

    series = jax.random.normal(k_series, (N, series_length, series_dim), jnp.float32)
    adm = jax.random.normal(k_adm, (N, adm_dim), jnp.float32)
    params = init_params(k_params, input_dim, hidden_size, 1)

    out = jax.block_until_ready(discriminator_forward(series, adm, params))

    # Plain-JAX f32 reference (eval-mode dropout = identity).
    w1, b1, gamma, beta, w2, b2 = params
    x = jnp.concatenate([series.reshape(N, -1), adm], axis=-1)
    h = x @ w1 + b1
    mean = jnp.mean(h, axis=-1, keepdims=True)
    var = jnp.mean((h - mean) ** 2, axis=-1, keepdims=True)
    h = (h - mean) * lax.rsqrt(var + EPS) * gamma + beta
    h = jnp.maximum(h, 0.0)
    ref = h @ w2 + b2

    assert out.shape == (N, 1), out.shape
    assert jnp.allclose(out, ref, atol=1e-2, rtol=1e-2), (out, ref)
    print("KERNEL_OK")
</pallas_src>

<mosaic_0001>
module attributes {stable_mosaic.version = 11 : i64} {
  func.func @_discriminator_kernel(%arg0: i32, %arg1: memref<37x8xf32, #tpu.memory_space<vmem>>, %arg2: memref<512x37xf32, #tpu.memory_space<vmem>>, %arg3: memref<2x512xf32, #tpu.memory_space<vmem>>, %arg4: memref<512x1xf32, #tpu.memory_space<vmem>>, %arg5: memref<512x1xf32, #tpu.memory_space<vmem>>, %arg6: memref<1x1xf32, #tpu.memory_space<vmem>>, %arg7: memref<1x8xf32, #tpu.memory_space<vmem>>) attributes {dimension_semantics = [#tpu.dimension_semantics<parallel>], iteration_bounds = array<i64: 1>, scalar_prefetch = 0 : i64, scratch_operands = 0 : i64, tpu.core_type = #tpu.core_type<tc>, window_params = [{transform_indices = @transform_0, window_bounds = array<i64: 37, 8>}, {pipeline_mode = #tpu.pipeline_mode<synchronous>, transform_indices = @transform_1, window_bounds = array<i64: 512, 37>}, {pipeline_mode = #tpu.pipeline_mode<synchronous>, transform_indices = @transform_2, window_bounds = array<i64: 2, 512>}, {pipeline_mode = #tpu.pipeline_mode<synchronous>, transform_indices = @transform_3, window_bounds = array<i64: 512, 1>}, {pipeline_mode = #tpu.pipeline_mode<synchronous>, transform_indices = @transform_4, window_bounds = array<i64: 512, 1>}, {pipeline_mode = #tpu.pipeline_mode<synchronous>, transform_indices = @transform_5, window_bounds = array<i64: 1, 1>}, {transform_indices = @transform_6, window_bounds = array<i64: 1, 8>}]} {
    %c0 = arith.constant 0 : index
    %c0_0 = arith.constant 0 : index
    %0 = vector.load %arg2[%c0, %c0_0] : memref<512x37xf32, #tpu.memory_space<vmem>>, vector<512x37xf32>
    %c0_1 = arith.constant 0 : index
    %c0_2 = arith.constant 0 : index
    %1 = vector.load %arg1[%c0_1, %c0_2] : memref<37x8xf32, #tpu.memory_space<vmem>>, vector<37x8xf32>
    %cst = arith.constant dense<0.000000e+00> : vector<512x8xf32>
    %2 = tpu.matmul %0, %1, %cst {dimension_numbers = #tpu.dot_dimension_numbers<[1], [0], [0], [1], [0, 0, 1, 1], [], []>} : vector<512x37xf32>, vector<37x8xf32>, vector<512x8xf32> -> vector<512x8xf32>
    %c0_3 = arith.constant 0 : index
    %c0_4 = arith.constant 0 : index
    %3 = vector.load %arg3[%c0_3, %c0_4] : memref<2x512xf32, #tpu.memory_space<vmem>>, vector<1x512xf32>
    %c1 = arith.constant 1 : index
    %c0_5 = arith.constant 0 : index
    %4 = vector.load %arg3[%c1, %c0_5] : memref<2x512xf32, #tpu.memory_space<vmem>>, vector<1x512xf32>
    %cst_6 = arith.constant dense<0.000000e+00> : vector<1x8xf32>
    %5 = tpu.matmul %3, %2, %cst_6 {dimension_numbers = #tpu.dot_dimension_numbers<[1], [0], [0], [1], [0, 0, 1, 1], [], []>} : vector<1x512xf32>, vector<512x8xf32>, vector<1x8xf32> -> vector<1x8xf32>
    %6 = arith.mulf %2, %2 : vector<512x8xf32>
    %cst_7 = arith.constant dense<0.000000e+00> : vector<1x8xf32>
    %7 = tpu.matmul %3, %6, %cst_7 {dimension_numbers = #tpu.dot_dimension_numbers<[1], [0], [0], [1], [0, 0, 1, 1], [], []>} : vector<1x512xf32>, vector<512x8xf32>, vector<1x8xf32> -> vector<1x8xf32>
    %cst_8 = arith.constant 0.001953125 : f32
    %8 = vector.broadcast %cst_8 : f32 to vector<1x8xf32>
    %9 = arith.mulf %5, %8 : vector<1x8xf32>
    %cst_9 = arith.constant 0.001953125 : f32
    %10 = vector.broadcast %cst_9 : f32 to vector<1x8xf32>
    %11 = arith.mulf %7, %10 : vector<1x8xf32>
    %12 = arith.mulf %9, %9 : vector<1x8xf32>
    %13 = arith.subf %11, %12 : vector<1x8xf32>
    %cst_10 = arith.constant 9.99999974E-6 : f32
    %14 = vector.broadcast %cst_10 : f32 to vector<1x8xf32>
    %15 = arith.addf %13, %14 : vector<1x8xf32>
    %16 = math.rsqrt %15 : vector<1x8xf32>
    %17 = vector.broadcast %9 : vector<1x8xf32> to vector<512x8xf32>
    %18 = arith.subf %2, %17 : vector<512x8xf32>
    %19 = vector.broadcast %16 : vector<1x8xf32> to vector<512x8xf32>
    %20 = arith.mulf %18, %19 : vector<512x8xf32>
    %c0_11 = arith.constant 0 : index
    %c0_12 = arith.constant 0 : index
    %21 = vector.load %arg4[%c0_11, %c0_12] : memref<512x1xf32, #tpu.memory_space<vmem>>, vector<512x1xf32>
    %22 = vector.broadcast %21 : vector<512x1xf32> to vector<512x8xf32>
    %23 = arith.mulf %20, %22 : vector<512x8xf32>
    %c0_13 = arith.constant 0 : index
    %c0_14 = arith.constant 0 : index
    %24 = vector.load %arg5[%c0_13, %c0_14] : memref<512x1xf32, #tpu.memory_space<vmem>>, vector<512x1xf32>
    %25 = vector.broadcast %24 : vector<512x1xf32> to vector<512x8xf32>
    %26 = arith.addf %23, %25 : vector<512x8xf32>
    %cst_15 = arith.constant 0.000000e+00 : f32
    %27 = vector.broadcast %cst_15 : f32 to vector<512x8xf32>
    %28 = arith.maximumf %26, %27 : vector<512x8xf32>
    %cst_16 = arith.constant dense<0.000000e+00> : vector<1x8xf32>
    %29 = tpu.matmul %4, %28, %cst_16 {dimension_numbers = #tpu.dot_dimension_numbers<[1], [0], [0], [1], [0, 0, 1, 1], [], []>} : vector<1x512xf32>, vector<512x8xf32>, vector<1x8xf32> -> vector<1x8xf32>
    %c0_17 = arith.constant 0 : index
    %c0_18 = arith.constant 0 : index
    %30 = vector.load %arg6[%c0_17, %c0_18] : memref<1x1xf32, #tpu.memory_space<vmem>>, vector<1x1xf32>
    %31 = vector.broadcast %30 : vector<1x1xf32> to vector<1x8xf32>
    %32 = arith.addf %29, %31 : vector<1x8xf32>
    %c0_19 = arith.constant 0 : index
    %c0_20 = arith.constant 0 : index
    %33 = vector.load %arg7[%c0_19, %c0_20] : memref<1x8xf32, #tpu.memory_space<vmem>>, vector<1x8xf32>
    tpu.vector_store %arg7[%c0_19, %c0_20], %32 {strides = array<i32>} : memref<1x8xf32, #tpu.memory_space<vmem>>, vector<1x8xf32>,
    return
  }
  func.func @transform_0(%arg0: i32) -> (i32, i32) {
    %c0_i32 = arith.constant 0 : i32
    %c0_i32_0 = arith.constant 0 : i32
    return %c0_i32, %arg0 : i32, i32
  }
  func.func @transform_1(%arg0: i32) -> (i32, i32) {
    %c0_i32 = arith.constant 0 : i32
    %c0_i32_0 = arith.constant 0 : i32
    %c0_i32_1 = arith.constant 0 : i32
    return %c0_i32, %c0_i32_0 : i32, i32
  }
  func.func @transform_2(%arg0: i32) -> (i32, i32) {
    %c0_i32 = arith.constant 0 : i32
    %c0_i32_0 = arith.constant 0 : i32
    %c0_i32_1 = arith.constant 0 : i32
    return %c0_i32, %c0_i32_0 : i32, i32
  }
  func.func @transform_3(%arg0: i32) -> (i32, i32) {
    %c0_i32 = arith.constant 0 : i32
    %c0_i32_0 = arith.constant 0 : i32
    %c0_i32_1 = arith.constant 0 : i32
    return %c0_i32, %c0_i32_0 : i32, i32
  }
  func.func @transform_4(%arg0: i32) -> (i32, i32) {
    %c0_i32 = arith.constant 0 : i32
    %c0_i32_0 = arith.constant 0 : i32
    %c0_i32_1 = arith.constant 0 : i32
    return %c0_i32, %c0_i32_0 : i32, i32
  }
  func.func @transform_5(%arg0: i32) -> (i32, i32) {
    %c0_i32 = arith.constant 0 : i32
    %c0_i32_0 = arith.constant 0 : i32
    %c0_i32_1 = arith.constant 0 : i32
    return %c0_i32, %c0_i32_0 : i32, i32
  }
  func.func @transform_6(%arg0: i32) -> (i32, i32) {
    %c0_i32 = arith.constant 0 : i32
    %c0_i32_0 = arith.constant 0 : i32
    return %c0_i32, %arg0 : i32, i32
  }
}

</mosaic_0001>

<bundles_post_ra>
// kernel: tpu_custom_call.1
= control target key start
LH: loop header
LB: loop body
LE: loop exit
PB: predicated region body
PF: predicated region fallthrough
CT: control target
= control target key end

     0   :  { %s4959_s0 = inlined_call_operand.vmem [shape: f32[37,8], index: 0, kind: input, shape index: {}]   ;;  %s4960_s1 = inlined_call_operand.vmem [shape: f32[512,37], index: 1, kind: input, shape index: {}]   ;;  %s4961_s2 = inlined_call_operand.vmem [shape: f32[2,512], index: 2, kind: input, shape index: {}]   ;;  %s4962_s3 = inlined_call_operand.vmem [shape: f32[512,1], index: 3, kind: input, shape index: {}]   ;;  %s4963_s4 = inlined_call_operand.vmem [shape: f32[512,1], index: 4, kind: input, shape index: {}]   ;;  %s4964_s5 = inlined_call_operand.<no memory space> [shape: f32[1,1], index: 5, kind: input, shape index: {}]   ;;  %s4965_s6 = inlined_call_operand.hbm [shape: f32[1,8], index: 6, kind: output, shape index: {}]  }
   0x1   :  { %v11_v0 = vstv %s4964_s5 }
   0x2   :  { %12 = vst [vmem:[#allocation2] sm:$0x1] %v11_v0 }
   0x3   :  { %v94_v1 = vld [vmem:[%s4959_s0 + $0x20] sm:$0x1f]  ;;  %vm288_vm0 = vcmask 1044480   ;;  %v93_v2 = vld [vmem:[%s4959_s0 + $0x18] sm:$0xff]  ;;  %vm95_vm1 = vcmask 302080   ;;  %v92_v4 = vld [vmem:[%s4959_s0 + $0x10] sm:$0xff] }
   0x4   :  { %2679 = vmatprep.subr.msk.mxu0 %vm288_vm0, %v94_v1  ;;  %v26_v3 = vld [vmem:[%s4960_s1] sm:$0xff]  ;;  %v2813_v5 = vmov 0   ;;  %v91_v6 = vld [vmem:[%s4959_s0 + $0x8] sm:$0xff]  ;;  %v28_v9 = vld [vmem:[%s4960_s1 + $0x10] sm:$0xff] }
   0x5   :  { %2680 = vmatpush3.msk.msra.mxu0 %vm288_vm0, %v94_v1  ;;  %2689 = vmatprep.mubr.msk.f32.mxu0 %vm95_vm1, %v26_v3  ;;  %v90_v7 = vld [vmem:[%s4959_s0] sm:$0xff]  ;;  %v27_v8 = vld [vmem:[%s4960_s1 + $0x8] sm:$0xff]  ;;  %v29_v10 = vld [vmem:[%s4960_s1 + $0x18] sm:$0xff] }
   0x6   :  { %2681 = vmatprep.subr.mxu0 %v93_v2  ;;  %2787 = vset.pattern.permute.xlu0 %v2813_v5  ;;  %v30_v11 = vld [vmem:[%s4960_s1 + $0x20] sm:$0xff]  ;;  %v31_v12 = vld [vmem:[%s4960_s1 + $0x28] sm:$0xff]  ;;  %v32_v13 = vld [vmem:[%s4960_s1 + $0x30] sm:$0xff] }
   0x7   :  { %2682 = vmatpush3.msra.mxu0 %v93_v2  ;;  %2788 = vset.pattern.permute.xlu1 %v2813_v5  ;;  %v33_v14 = vld [vmem:[%s4960_s1 + $0x38] sm:$0xff]  ;;  %v34_v15 = vld [vmem:[%s4960_s1 + $0x40] sm:$0xff]  ;;  %v1189_v17 = vld [vmem:[%s4962_s3 + $0x10] sm:$0xff] }
   0x8   :  { %2683 = vmatprep.subr.mxu0 %v92_v4  ;;  %v1187_v16 = vld [vmem:[%s4962_s3] sm:$0xff]  ;;  %v35_v18 = vld [vmem:[%s4960_s1 + $0x48] sm:$0xff]  ;;  %v36_v19 = vld [vmem:[%s4960_s1 + $0x50] sm:$0xff]  ;;  %1263 = vperm.xlu1 %2788, %v1189_v17  }
   0x9   :  { %2684 = vmatpush3.msra.mxu0 %v92_v4  ;;  %1253 = vperm.xlu0 %2787, %v1187_v16   ;;  %v1188_v20 = vld [vmem:[%s4962_s3 + $0x8] sm:$0xff]  ;;  %v1190_v21 = vld [vmem:[%s4962_s3 + $0x18] sm:$0xff]  ;;  %v38_v23 = vld [vmem:[%s4960_s1 + $0x60] sm:$0xff] }
   0xa   :  { %2685 = vmatprep.subr.mxu0 %v91_v6  ;;  %v37_v22 = vld [vmem:[%s4960_s1 + $0x58] sm:$0xff]  ;;  %v1191_v24 = vld [vmem:[%s4962_s3 + $0x20] sm:$0xff]  ;;  %v1192_v25 = vld [vmem:[%s4962_s3 + $0x28] sm:$0xff] }
   0xb   :  { %2686 = vmatpush3.msra.mxu0 %v91_v6  ;;  %v39_v26 = vld [vmem:[%s4960_s1 + $0x68] sm:$0xff]  ;;  %v40_v27 = vld [vmem:[%s4960_s1 + $0x70] sm:$0xff]  ;;  %v1194_v29 = vld [vmem:[%s4962_s3 + $0x38] sm:$0xff] }
   0xc   :  { %2687 = vmatprep.subr.mxu0 %v90_v7  ;;  %1268 = vperm.xlu1 %2788, %v1190_v21   ;;  %v1193_v28 = vld [vmem:[%s4962_s3 + $0x30] sm:$0xff]  ;;  %v41_v30 = vld [vmem:[%s4960_s1 + $0x78] sm:$0xff]  ;;  %v42_v31 = vld [vmem:[%s4960_s1 + $0x80] sm:$0xff] }
   0xd   :  { %2688 = vmatpush3.msra.mxu0 %v90_v7  ;;  %1258 = vperm.xlu0 %2787, %v1188_v20   ;;  %v1195_v32 = vld [vmem:[%s4962_s3 + $0x40] sm:$0xff]  ;;  %v1196_v33 = vld [vmem:[%s4962_s3 + $0x48] sm:$0xff]  ;;  %v44_v35 = vld [vmem:[%s4960_s1 + $0x90] sm:$0xff] }
   0xe   :  { %2690 = vmatmul.mubr.msk.f32.vlgmr.msra.gmra.mxu0 %vm95_vm1, %v27_v8  ;;  %v43_v34 = vld [vmem:[%s4960_s1 + $0x88] sm:$0xff]  ;;  %v1197_v36 = vld [vmem:[%s4962_s3 + $0x50] sm:$0xff]  ;;  %v1198_v37 = vld [vmem:[%s4962_s3 + $0x58] sm:$0xff] }
   0xf   :  { %2692 = vmatprep.mubr.msk.f32.mxu0 %vm95_vm1, %v28_v9 }
  0x10   :  { %1278 = vperm.xlu1 %2788, %v1192_v25  }
  0x11   :  { %1273 = vperm.xlu0 %2787, %v1191_v24  }
  0x12   :  { %2693 = vmatmul.mubr.msk.f32.gmra.mxu0 %vm95_vm1, %v29_v10 }
  0x13   :  { %2695 = vmatprep.mubr.msk.f32.mxu0 %vm95_vm1, %v30_v11 }
  0x14   :  { %1288 = vperm.xlu1 %2788, %v1194_v29  }
  0x15   :  { %1283 = vperm.xlu0 %2787, %v1193_v28  }
  0x16   :  { %2696 = vmatmul.mubr.msk.f32.gmra.mxu0 %vm95_vm1, %v31_v12 }
  0x17   :  { %2698 = vmatprep.mubr.msk.f32.mxu0 %vm95_vm1, %v32_v13 }
  0x18   :  { %1298 = vperm.xlu1 %2788, %v1196_v33  }
  0x19   :  { %1293 = vperm.xlu0 %2787, %v1195_v32  }
  0x1a   :  { %2699 = vmatmul.mubr.msk.f32.gmra.mxu0 %vm95_vm1, %v33_v14 }
  0x1b   :  { %2701 = vmatprep.mubr.msk.f32.mxu0 %vm95_vm1, %v34_v15 }
  0x1e   :  { %2702 = vmatmul.mubr.msk.f32.gmra.mxu0 %vm95_vm1, %v35_v18 }
  0x1f   :  { %2704 = vmatprep.mubr.msk.f32.mxu0 %vm95_vm1, %v36_v19 }
  0x22   :  { %2705 = vmatmul.mubr.msk.f32.gmra.mxu0 %vm95_vm1, %v37_v22 }
  0x23   :  { %2707 = vmatprep.mubr.msk.f32.mxu0 %vm95_vm1, %v38_v23 }
  0x26   :  { %2708 = vmatmul.mubr.msk.f32.gmra.mxu0 %vm95_vm1, %v39_v26 }
  0x27   :  { %2710 = vmatprep.mubr.msk.f32.mxu0 %vm95_vm1, %v40_v27 }
  0x2a   :  { %2711 = vmatmul.mubr.msk.f32.gmra.mxu0 %vm95_vm1, %v41_v30 }
  0x2b   :  { %2713 = vmatprep.mubr.msk.f32.mxu0 %vm95_vm1, %v42_v31 }
  0x2e   :  { %2714 = vmatmul.mubr.msk.f32.gmra.mxu0 %vm95_vm1, %v43_v34 }
  0x2f   :  { %13 = vsyncpa [#allocation4], 0  ;;  %2716 = vmatprep.mubr.msk.f32.mxu0 %vm95_vm1, %v44_v35  ;;  %v45_v38 = vld [vmem:[%s4960_s1 + $0x98] sm:$0xff]  ;;  %1303 = vperm.xlu0 %2787, %v1197_v36   ;;  %v46_v39 = vld [vmem:[%s4960_s1 + $0xa0] sm:$0xff]  ;;  %vm2318_vm2 = vcmask 57344  }
  0x30   :  { %v1199_v40 = vld [vmem:[%s4962_s3 + $0x60] sm:$0xff]  ;;  %1308 = vperm.xlu1 %2788, %v1198_v37   ;;  %v1200_v41 = vld [vmem:[%s4962_s3 + $0x68] sm:$0xff]  ;;  %v48_v43 = vld [vmem:[%s4960_s1 + $0xb0] sm:$0xff] }
  0x31   :  { %v47_v42 = vld [vmem:[%s4960_s1 + $0xa8] sm:$0xff]  ;;  %v1201_v44 = vld [vmem:[%s4962_s3 + $0x70] sm:$0xff]  ;;  %v1202_v45 = vld [vmem:[%s4962_s3 + $0x78] sm:$0xff] }
  0x32   :  { %2717 = vmatmul.mubr.msk.f32.gmra.mxu0 %vm95_vm1, %v45_v38  ;;  %v49_v46 = vld [vmem:[%s4960_s1 + $0xb8] sm:$0xff]  ;;  %v50_v47 = vld [vmem:[%s4960_s1 + $0xc0] sm:$0xff]  ;;  %v1204_v49 = vld [vmem:[%s4962_s3 + $0x88] sm:$0xff] }
  0x33   :  { %2719 = vmatprep.mubr.msk.f32.mxu0 %vm95_vm1, %v46_v39  ;;  %1313 = vperm.xlu0 %2787, %v1199_v40   ;;  %v1203_v48 = vld [vmem:[%s4962_s3 + $0x80] sm:$0xff]  ;;  %v51_v50 = vld [vmem:[%s4960_s1 + $0xc8] sm:$0xff]  ;;  %v52_v51 = vld [vmem:[%s4960_s1 + $0xd0] sm:$0xff] }
  0x34   :  { %1318 = vperm.xlu1 %2788, %v1200_v41   ;;  %v1205_v52 = vld [vmem:[%s4962_s3 + $0x90] sm:$0xff]  ;;  %v1206_v53 = vld [vmem:[%s4962_s3 + $0x98] sm:$0xff]  ;;  %v54_v55 = vld [vmem:[%s4960_s1 + $0xe0] sm:$0xff] }
  0x35   :  { %v53_v54 = vld [vmem:[%s4960_s1 + $0xd8] sm:$0xff]  ;;  %v1207_v56 = vld [vmem:[%s4962_s3 + $0xa0] sm:$0xff]  ;;  %v1208_v57 = vld [vmem:[%s4962_s3 + $0xa8] sm:$0xff] }
  0x36   :  { %2720 = vmatmul.mubr.msk.f32.gmra.mxu0 %vm95_vm1, %v47_v42  ;;  %v55_v58 = vld [vmem:[%s4960_s1 + $0xe8] sm:$0xff]  ;;  %v56_v59 = vld [vmem:[%s4960_s1 + $0xf0] sm:$0xff]  ;;  %v1210_v61 = vld [vmem:[%s4962_s3 + $0xb8] sm:$0xff] }
  0x37   :  { %2722 = vmatprep.mubr.msk.f32.mxu0 %vm95_vm1, %v48_v43  ;;  %1323 = vperm.xlu0 %2787, %v1201_v44   ;;  %v1209_v60 = vld [vmem:[%s4962_s3 + $0xb0] sm:$0xff]  ;;  %v57_v62 = vld [vmem:[%s4960_s1 + $0xf8] sm:$0xff]  ;;  %v58_v63 = vld [vmem:[%s4960_s1 + $0x100] sm:$0xff] }
  0x38   :  { %1328 = vperm.xlu1 %2788, %v1202_v45   ;;  %v1211_v0 = vld [vmem:[%s4962_s3 + $0xc0] sm:$0xff]  ;;  %v1212_v1 = vld [vmem:[%s4962_s3 + $0xc8] sm:$0xff]  ;;  %v60_v3 = vld [vmem:[%s4960_s1 + $0x110] sm:$0xff] }
  0x39   :  { %v59_v2 = vld [vmem:[%s4960_s1 + $0x108] sm:$0xff]  ;;  %v1213_v4 = vld [vmem:[%s4962_s3 + $0xd0] sm:$0xff]  ;;  %v1214_v5 = vld [vmem:[%s4962_s3 + $0xd8] sm:$0xff] }
  0x3a   :  { %2723 = vmatmul.mubr.msk.f32.gmra.mxu0 %vm95_vm1, %v49_v46  ;;  %v61_v6 = vld [vmem:[%s4960_s1 + $0x118] sm:$0xff]  ;;  %v62_v7 = vld [vmem:[%s4960_s1 + $0x120] sm:$0xff]  ;;  %v1216_v9 = vld [vmem:[%s4962_s3 + $0xe8] sm:$0xff] }
  0x3b   :  { %2725 = vmatprep.mubr.msk.f32.mxu0 %vm95_vm1, %v50_v47  ;;  %1333 = vperm.xlu0 %2787, %v1203_v48   ;;  %v1215_v8 = vld [vmem:[%s4962_s3 + $0xe0] sm:$0xff]  ;;  %v63_v10 = vld [vmem:[%s4960_s1 + $0x128] sm:$0xff]  ;;  %v64_v11 = vld [vmem:[%s4960_s1 + $0x130] sm:$0xff] }
  0x3c   :  { %1338 = vperm.xlu1 %2788, %v1204_v49   ;;  %v1217_v12 = vld [vmem:[%s4962_s3 + $0xf0] sm:$0xff]  ;;  %v1218_v13 = vld [vmem:[%s4962_s3 + $0xf8] sm:$0xff]  ;;  %v66_v15 = vld [vmem:[%s4960_s1 + $0x140] sm:$0xff] }
  0x3d   :  { %v65_v14 = vld [vmem:[%s4960_s1 + $0x138] sm:$0xff]  ;;  %v1219_v16 = vld [vmem:[%s4962_s3 + $0x100] sm:$0xff]  ;;  %v1220_v17 = vld [vmem:[%s4962_s3 + $0x108] sm:$0xff] }
  0x3e   :  { %2726 = vmatmul.mubr.msk.f32.gmra.mxu0 %vm95_vm1, %v51_v50  ;;  %v67_v18 = vld [vmem:[%s4960_s1 + $0x148] sm:$0xff]  ;;  %v68_v19 = vld [vmem:[%s4960_s1 + $0x150] sm:$0xff]  ;;  %v1222_v21 = vld [vmem:[%s4962_s3 + $0x118] sm:$0xff] }
  0x3f   :  { %2728 = vmatprep.mubr.msk.f32.mxu0 %vm95_vm1, %v52_v51  ;;  %1343 = vperm.xlu0 %2787, %v1205_v52   ;;  %v1221_v20 = vld [vmem:[%s4962_s3 + $0x110] sm:$0xff]  ;;  %v69_v22 = vld [vmem:[%s4960_s1 + $0x158] sm:$0xff]  ;;  %v70_v23 = vld [vmem:[%s4960_s1 + $0x160] sm:$0xff] }
  0x40   :  { %1348 = vperm.xlu1 %2788, %v1206_v53   ;;  %v1223_v24 = vld [vmem:[%s4962_s3 + $0x120] sm:$0xff]  ;;  %v1224_v25 = vld [vmem:[%s4962_s3 + $0x128] sm:$0xff]  ;;  %v72_v27 = vld [vmem:[%s4960_s1 + $0x170] sm:$0xff] }
  0x41   :  { %v71_v26 = vld [vmem:[%s4960_s1 + $0x168] sm:$0xff]  ;;  %v1225_v28 = vld [vmem:[%s4962_s3 + $0x130] sm:$0xff]  ;;  %v1226_v29 = vld [vmem:[%s4962_s3 + $0x138] sm:$0xff] }
  0x42   :  { %2729 = vmatmul.mubr.msk.f32.gmra.mxu0 %vm95_vm1, %v53_v54  ;;  %v73_v30 = vld [vmem:[%s4960_s1 + $0x178] sm:$0xff]  ;;  %v74_v31 = vld [vmem:[%s4960_s1 + $0x180] sm:$0xff]  ;;  %v1228_v33 = vld [vmem:[%s4962_s3 + $0x148] sm:$0xff] }
  0x43   :  { %2731 = vmatprep.mubr.msk.f32.mxu0 %vm95_vm1, %v54_v55  ;;  %1353 = vperm.xlu0 %2787, %v1207_v56   ;;  %v1227_v32 = vld [vmem:[%s4962_s3 + $0x140] sm:$0xff]  ;;  %v75_v34 = vld [vmem:[%s4960_s1 + $0x188] sm:$0xff]  ;;  %v76_v35 = vld [vmem:[%s4960_s1 + $0x190] sm:$0xff] }
  0x44   :  { %1358 = vperm.xlu1 %2788, %v1208_v57   ;;  %v1229_v36 = vld [vmem:[%s4962_s3 + $0x150] sm:$0xff]  ;;  %v1230_v37 = vld [vmem:[%s4962_s3 + $0x158] sm:$0xff]  ;;  %v78_v39 = vld [vmem:[%s4960_s1 + $0x1a0] sm:$0xff] }
  0x45   :  { %v77_v38 = vld [vmem:[%s4960_s1 + $0x198] sm:$0xff]  ;;  %v1231_v40 = vld [vmem:[%s4962_s3 + $0x160] sm:$0xff]  ;;  %v1232_v41 = vld [vmem:[%s4962_s3 + $0x168] sm:$0xff] }
  0x46   :  { %2732 = vmatmul.mubr.msk.f32.gmra.mxu0 %vm95_vm1, %v55_v58  ;;  %v79_v42 = vld [vmem:[%s4960_s1 + $0x1a8] sm:$0xff]  ;;  %v80_v43 = vld [vmem:[%s4960_s1 + $0x1b0] sm:$0xff]  ;;  %v1234_v45 = vld [vmem:[%s4962_s3 + $0x178] sm:$0xff] }
  0x47   :  { %2734 = vmatprep.mubr.msk.f32.mxu0 %vm95_vm1, %v56_v59  ;;  %1363 = vperm.xlu0 %2787, %v1209_v60   ;;  %v1233_v44 = vld [vmem:[%s4962_s3 + $0x170] sm:$0xff]  ;;  %v81_v46 = vld [vmem:[%s4960_s1 + $0x1b8] sm:$0xff]  ;;  %v82_v47 = vld [vmem:[%s4960_s1 + $0x1c0] sm:$0xff] }
  0x48   :  { %1368 = vperm.xlu1 %2788, %v1210_v61   ;;  %v1235_v48 = vld [vmem:[%s4962_s3 + $0x180] sm:$0xff]  ;;  %v1236_v49 = vld [vmem:[%s4962_s3 + $0x188] sm:$0xff]  ;;  %v84_v51 = vld [vmem:[%s4960_s1 + $0x1d0] sm:$0xff] }
  0x49   :  { %v83_v50 = vld [vmem:[%s4960_s1 + $0x1c8] sm:$0xff]  ;;  %v1237_v52 = vld [vmem:[%s4962_s3 + $0x190] sm:$0xff]  ;;  %v1238_v53 = vld [vmem:[%s4962_s3 + $0x198] sm:$0xff] }
  0x4a   :  { %2735 = vmatmul.mubr.msk.f32.gmra.mxu0 %vm95_vm1, %v57_v62  ;;  %v85_v54 = vld [vmem:[%s4960_s1 + $0x1d8] sm:$0xff]  ;;  %v86_v55 = vld [vmem:[%s4960_s1 + $0x1e0] sm:$0xff]  ;;  %v1240_v57 = vld [vmem:[%s4962_s3 + $0x1a8] sm:$0xff] }
  0x4b   :  { %2737 = vmatprep.mubr.msk.f32.mxu0 %vm95_vm1, %v58_v63  ;;  %1373 = vperm.xlu0 %2787, %v1211_v0   ;;  %v1239_v56 = vld [vmem:[%s4962_s3 + $0x1a0] sm:$0xff]  ;;  %v87_v58 = vld [vmem:[%s4960_s1 + $0x1e8] sm:$0xff]  ;;  %v88_v59 = vld [vmem:[%s4960_s1 + $0x1f0] sm:$0xff] }
  0x4c   :  { %1378 = vperm.xlu1 %2788, %v1212_v1   ;;  %v1250_v60 = vld [vmem:[%s4962_s3 + $0x1f8] sm:$0xff]  ;;  %v1249_v0 = vld [vmem:[%s4962_s3 + $0x1f0] sm:$0xff] }
  0x4d   :  { %v1666_v61 = vld [vmem:[%s4963_s4 + $0xf8] sm:$0xff]  ;;  %v1665_v1 = vld [vmem:[%s4963_s4 + $0xf0] sm:$0xff] }
  0x4e   :  { %2738 = vmatmul.mubr.msk.f32.gmra.mxu0 %vm95_vm1, %v59_v2  ;;  %v89_v62 = vld [vmem:[%s4960_s1 + $0x1f8] sm:$0xff] }
  0x4f   :  { %2740 = vmatprep.mubr.msk.f32.mxu0 %vm95_vm1, %v60_v3  ;;  %1383 = vperm.xlu0 %2787, %v1213_v4   ;;  %v1650_v63 = vld [vmem:[%s4963_s4 + $0x78] sm:$0xff]  ;;  %v1649_v3 = vld [vmem:[%s4963_s4 + $0x70] sm:$0xff] }
  0x50   :  { %1388 = vperm.xlu1 %2788, %v1214_v5   ;;  %v1698_v2 = vld [vmem:[%s4963_s4 + $0x1f8] sm:$0xff]  ;;  %v1248_v5 = vld [vmem:[%s4962_s3 + $0x1e8] sm:$0xff] }
  0x51   :  { %v1682_v4 = vld [vmem:[%s4963_s4 + $0x178] sm:$0xff] }
  0x52   :  { %2741 = vmatmul.mubr.msk.f32.gmra.mxu0 %vm95_vm1, %v61_v6  ;;  %v1664_v6 = vld [vmem:[%s4963_s4 + $0xe8] sm:$0xff] }
  0x53   :  { %2743 = vmatprep.mubr.msk.f32.mxu0 %vm95_vm1, %v62_v7  ;;  %1393 = vperm.xlu0 %2787, %v1215_v8   ;;  %v1697_v7 = vld [vmem:[%s4963_s4 + $0x1f0] sm:$0xff]  ;;  %v1648_v8 = vld [vmem:[%s4963_s4 + $0x68] sm:$0xff] }
  0x54   :  { %1398 = vperm.xlu1 %2788, %v1216_v9   ;;  %v1681_v9 = vld [vmem:[%s4963_s4 + $0x170] sm:$0xff] }
  0x56   :  { %2744 = vmatmul.mubr.msk.f32.gmra.mxu0 %vm95_vm1, %v63_v10  ;;  %v1247_v10 = vld [vmem:[%s4962_s3 + $0x1e0] sm:$0xff] }
  0x57   :  { %2746 = vmatprep.mubr.msk.f32.mxu0 %vm95_vm1, %v64_v11  ;;  %1403 = vperm.xlu0 %2787, %v1217_v12   ;;  %v1663_v11 = vld [vmem:[%s4963_s4 + $0xe0] sm:$0xff]  ;;  %v1696_v12 = vld [vmem:[%s4963_s4 + $0x1e8] sm:$0xff] }
  0x58   :  { %1408 = vperm.xlu1 %2788, %v1218_v13   ;;  %v1647_v13 = vld [vmem:[%s4963_s4 + $0x60] sm:$0xff] }
  0x5a   :  { %2747 = vmatmul.mubr.msk.f32.gmra.mxu0 %vm95_vm1, %v65_v14  ;;  %v1680_v14 = vld [vmem:[%s4963_s4 + $0x168] sm:$0xff] }
  0x5b   :  { %2749 = vmatprep.mubr.msk.f32.mxu0 %vm95_vm1, %v66_v15  ;;  %1413 = vperm.xlu0 %2787, %v1219_v16   ;;  %v1246_v15 = vld [vmem:[%s4962_s3 + $0x1d8] sm:$0xff] }
  0x5c   :  { %1418 = vperm.xlu1 %2788, %v1220_v17   ;;  %v1662_v16 = vld [vmem:[%s4963_s4 + $0xd8] sm:$0xff]  ;;  %v1695_v17 = vld [vmem:[%s4963_s4 + $0x1e0] sm:$0xff] }
  0x5e   :  { %2750 = vmatmul.mubr.msk.f32.gmra.mxu0 %vm95_vm1, %v67_v18  ;;  %v1646_v18 = vld [vmem:[%s4963_s4 + $0x58] sm:$0xff] }
  0x5f   :  { %2752 = vmatprep.mubr.msk.f32.mxu0 %vm95_vm1, %v68_v19  ;;  %1423 = vperm.xlu0 %2787, %v1221_v20   ;;  %v1679_v19 = vld [vmem:[%s4963_s4 + $0x160] sm:$0xff]  ;;  %v1245_v20 = vld [vmem:[%s4962_s3 + $0x1d0] sm:$0xff] }
  0x60   :  { %1428 = vperm.xlu1 %2788, %v1222_v21   ;;  %v1661_v21 = vld [vmem:[%s4963_s4 + $0xd0] sm:$0xff] }
  0x62   :  { %2753 = vmatmul.mubr.msk.f32.gmra.mxu0 %vm95_vm1, %v69_v22  ;;  %v1694_v22 = vld [vmem:[%s4963_s4 + $0x1d8] sm:$0xff] }
  0x63   :  { %2755 = vmatprep.mubr.msk.f32.mxu0 %vm95_vm1, %v70_v23  ;;  %1433 = vperm.xlu0 %2787, %v1223_v24   ;;  %v1645_v23 = vld [vmem:[%s4963_s4 + $0x50] sm:$0xff]  ;;  %v1678_v24 = vld [vmem:[%s4963_s4 + $0x158] sm:$0xff] }
  0x64   :  { %1438 = vperm.xlu1 %2788, %v1224_v25   ;;  %v1244_v25 = vld [vmem:[%s4962_s3 + $0x1c8] sm:$0xff] }
  0x66   :  { %2756 = vmatmul.mubr.msk.f32.gmra.mxu0 %vm95_vm1, %v71_v26  ;;  %v1660_v26 = vld [vmem:[%s4963_s4 + $0xc8] sm:$0xff] }
  0x67   :  { %2758 = vmatprep.mubr.msk.f32.mxu0 %vm95_vm1, %v72_v27  ;;  %1443 = vperm.xlu0 %2787, %v1225_v28   ;;  %v1693_v27 = vld [vmem:[%s4963_s4 + $0x1d0] sm:$0xff] }
  0x68   :  { %1448 = vperm.xlu1 %2788, %v1226_v29   ;;  %v1644_v29 = vld [vmem:[%s4963_s4 + $0x48] sm:$0xff] }
  0x6a   :  { %2759 = vmatmul.mubr.msk.f32.gmra.mxu0 %vm95_vm1, %v73_v30  ;;  %v681_v30 = vlaneseq }
  0x6b   :  { %2761 = vmatprep.mubr.msk.f32.mxu0 %vm95_vm1, %v74_v31  ;;  %1453 = vperm.xlu0 %2787, %v1227_v32  }
  0x6c   :  { %1458 = vperm.xlu1 %2788, %v1228_v33   ;;  %v3384_v31 = vshrl.u32 %v681_v30, 7  ;;  %v1677_v33 = vld [vmem:[%s4963_s4 + $0x150] sm:$0xff] }
  0x6e   :  { %2762 = vmatmul.mubr.msk.f32.gmra.mxu0 %vm95_vm1, %v75_v34  ;;  %5036 = vst [vmem:[#allocation7_spill] sm:$0xff] %v3384_v31  ;;  %v1243_v34 = vld [vmem:[%s4962_s3 + $0x1c0] sm:$0xff] }
  0x6f   :  { %2764 = vmatprep.mubr.msk.f32.mxu0 %vm95_vm1, %v76_v35  ;;  %1463 = vperm.xlu0 %2787, %v1229_v36   ;;  %v4966_v35 = vsub.s32 1, %v3384_v31  ;;  %v3398_v36 = vld [vmem:[%s4961_s2] ss:$2 sm:$0xf] }
  0x70   :  { %1468 = vperm.xlu1 %2788, %v1230_v37  }
  0x72   :  { %2765 = vmatmul.mubr.msk.f32.gmra.mxu0 %vm95_vm1, %v77_v38  ;;  %v3405_v38 = vrot.slane %v3398_v36, %v4966_v35 }
  0x73   :  { %2767 = vmatprep.mubr.msk.f32.mxu0 %vm95_vm1, %v78_v39  ;;  %1473 = vperm.xlu0 %2787, %v1231_v40   ;;  %v1659_v39 = vld [vmem:[%s4963_s4 + $0xc0] sm:$0xff]  ;;  %v1692_v40 = vld [vmem:[%s4963_s4 + $0x1c8] sm:$0xff] }
  0x74   :  { %1478 = vperm.xlu1 %2788, %v1232_v41   ;;  %765 = vmatprep.mubr.f32.mxu1 %v3405_v38 }
  0x76   :  { %2768 = vmatmul.mubr.msk.f32.gmra.mxu0 %vm95_vm1, %v79_v42  ;;  %v1643_v42 = vld [vmem:[%s4963_s4 + $0x40] sm:$0xff] }
  0x77   :  { %2770 = vmatprep.mubr.msk.f32.mxu0 %vm95_vm1, %v80_v43  ;;  %1483 = vperm.xlu0 %2787, %v1233_v44   ;;  %v1676_v44 = vld [vmem:[%s4963_s4 + $0x148] sm:$0xff] }
  0x78   :  { %1488 = vperm.xlu1 %2788, %v1234_v45  }
  0x7a   :  { %2771 = vmatmul.mubr.msk.f32.gmra.mxu0 %vm95_vm1, %v81_v46 }
  0x7b   :  { %2773 = vmatprep.mubr.msk.f32.mxu0 %vm95_vm1, %v82_v47  ;;  %1493 = vperm.xlu0 %2787, %v1235_v48   ;;  %v1242_v48 = vld [vmem:[%s4962_s3 + $0x1b8] sm:$0xff] }
  0x7c   :  { %1498 = vperm.xlu1 %2788, %v1236_v49   ;;  %v1658_v49 = vld [vmem:[%s4963_s4 + $0xb8] sm:$0xff] }
  0x7e   :  { %2774 = vmatmul.mubr.msk.f32.gmra.mxu0 %vm95_vm1, %v83_v50 }
  0x7f   :  { %2776 = vmatprep.mubr.msk.f32.mxu0 %vm95_vm1, %v84_v51  ;;  %1503 = vperm.xlu0 %2787, %v1237_v52  }
  0x80   :  { %1508 = vperm.xlu1 %2788, %v1238_v53   ;;  %v1691_v53 = vld [vmem:[%s4963_s4 + $0x1c0] sm:$0xff] }
  0x82   :  { %2777 = vmatmul.mubr.msk.f32.gmra.mxu0 %vm95_vm1, %v85_v54  ;;  %v1642_v54 = vld [vmem:[%s4963_s4 + $0x38] sm:$0xff] }
  0x83   :  { %2779 = vmatprep.mubr.msk.f32.mxu0 %vm95_vm1, %v86_v55  ;;  %1513 = vperm.xlu0 %2787, %v1239_v56   ;;  %v3386_v32 = vpop.permute.xlu1 %1263 }
  0x84   :  { %1518 = vperm.xlu1 %2788, %v1240_v57   ;;  %v3379_v28 = vpop.permute.xlu0 %1253  ;;  %5037 = vst [vmem:[#allocation8_spill] sm:$0xff] %v3386_v32 }
  0x85   :  { %5035 = vst [vmem:[#allocation6_spill] sm:$0xff] %v3379_v28 }
  0x86   :  { %2780 = vmatmul.mubr.msk.f32.gmra.mxu0 %vm95_vm1, %v87_v58  ;;  %v1675_v58 = vld [vmem:[%s4963_s4 + $0x140] sm:$0xff] }
  0x87   :  { %2782 = vmatprep.mubr.msk.f32.mxu0 %vm95_vm1, %v88_v59  ;;  %1568 = vperm.xlu0 %2787, %v1250_v60   ;;  %v3414_v41 = vpop.permute.xlu1 %1268  ;;  %v1241_v60 = vld [vmem:[%s4962_s3 + $0x1b0] sm:$0xff] }
  0x88   :  { %1856 = vperm.xlu1 %2788, %v1666_v61   ;;  %v3400_v37 = vpop.permute.xlu0 %1258  ;;  %5039 = vst [vmem:[#allocation10_spill] sm:$0xff] %v3414_v41 }
  0x89   :  { %5038 = vst [vmem:[#allocation9_spill] sm:$0xff] %v3400_v37 }
  0x8a   :  { %2783 = vmatmul.mubr.msk.f32.gmra.mxu0 %vm95_vm1, %v89_v62 }
  0x8b   :  { %1776 = vperm.xlu0 %2787, %v1650_v63   ;;  %v3428_v47 = vpop.permute.xlu1 %1278 }
  0x8c   :  { %1563 = vperm.xlu1 %2788, %v1249_v0   ;;  %v3419_v43 = vpop.permute.xlu0 %1273  ;;  %5043 = vst [vmem:[#allocation14_spill] sm:$0xff] %v3428_v47  ;;  %v1657_v0 = vld [vmem:[%s4963_s4 + $0xb0] sm:$0xff] }
  0x8d   :  { %5040 = vst [vmem:[#allocation11_spill] sm:$0xff] %v3419_v43 }
  0x8f   :  { %1851 = vperm.xlu0 %2787, %v1665_v1   ;;  %v3450_v56 = vpop.permute.xlu1 %1288  ;;  %v1690_v1 = vld [vmem:[%s4963_s4 + $0x1b8] sm:$0xff] }
  0x90   :  { %2016 = vperm.xlu1 %2788, %v1698_v2   ;;  %v3438_v51 = vpop.permute.xlu0 %1283  ;;  %5045 = vst [vmem:[#allocation16_spill] sm:$0xff] %v3450_v56 }
  0x91   :  { %5044 = vst [vmem:[#allocation15_spill] sm:$0xff] %v3438_v51 }
  0x93   :  { %1771 = vperm.xlu0 %2787, %v1649_v3   ;;  %v3466_v63 = vpop.permute.xlu1 %1298 }
  0x94   :  { %1936 = vperm.xlu1 %2788, %v1682_v4   ;;  %v3457_v59 = vpop.permute.xlu0 %1293  ;;  %5047 = vst [vmem:[#allocation18_spill] sm:$0xff] %v3466_v63 }
  0x95   :  { %5046 = vst [vmem:[#allocation17_spill] sm:$0xff] %v3457_v59 }
  0x97   :  { %1558 = vperm.xlu0 %2787, %v1248_v5   ;;  %v1641_v5 = vld [vmem:[%s4963_s4 + $0x30] sm:$0xff] }
  0x98   :  { %1846 = vperm.xlu1 %2788, %v1664_v6   ;;  %v1674_v6 = vld [vmem:[%s4963_s4 + $0x138] sm:$0xff] }
  0x9b   :  { %2011 = vperm.xlu0 %2787, %v1697_v7  }
  0x9c   :  { %1766 = vperm.xlu1 %2788, %v1648_v8  }
  0x9f   :  { %1931 = vperm.xlu0 %2787, %v1681_v9  }
  0xa0   :  { %1553 = vperm.xlu1 %2788, %v1247_v10   ;;  %v1656_v10 = vld [vmem:[%s4963_s4 + $0xa8] sm:$0xff] }
  0xa3   :  { %1841 = vperm.xlu0 %2787, %v1663_v11  }
  0xa4   :  { %2006 = vperm.xlu1 %2788, %v1696_v12   ;;  %v1689_v12 = vld [vmem:[%s4963_s4 + $0x1b0] sm:$0xff] }
  0xa7   :  { %1761 = vperm.xlu0 %2787, %v1647_v13  }
  0xa8   :  { %1926 = vperm.xlu1 %2788, %v1680_v14  }
  0xaa   :  { %v3476_v3 = vpop.permute.xlu0 %1303 }
  0xab   :  { %1548 = vperm.xlu0 %2787, %v1246_v15   ;;  %5048 = vst [vmem:[#allocation19_spill] sm:$0xff] %v3476_v3  ;;  %v3488_v8 = vpop.permute.xlu1 %1308 }
  0xac   :  { %1836 = vperm.xlu1 %2788, %v1662_v16   ;;  %5049 = vst [vmem:[#allocation20_spill] sm:$0xff] %v3488_v8  ;;  %v1640_v16 = vld [vmem:[%s4963_s4 + $0x28] sm:$0xff] }
  0xae   :  { %v3495_v11 = vpop.permute.xlu0 %1313 }
  0xaf   :  { %2001 = vperm.xlu0 %2787, %v1695_v17   ;;  %5050 = vst [vmem:[#allocation21_spill] sm:$0xff] %v3495_v11  ;;  %v3504_v15 = vpop.permute.xlu1 %1318  ;;  %v1673_v17 = vld [vmem:[%s4963_s4 + $0x130] sm:$0xff] }
  0xb0   :  { %1756 = vperm.xlu1 %2788, %v1646_v18   ;;  %5051 = vst [vmem:[#allocation22_spill] sm:$0xff] %v3504_v15 }
  0xb3   :  { %1921 = vperm.xlu0 %2787, %v1679_v19   ;;  %v3514_v19 = vpop.permute.xlu0 %1323 }
  0xb4   :  { %1543 = vperm.xlu1 %2788, %v1245_v20   ;;  %5052 = vst [vmem:[#allocation23_spill] sm:$0xff] %v3514_v19 }
  0xb7   :  { %1831 = vperm.xlu0 %2787, %v1661_v21   ;;  %v1655_v21 = vld [vmem:[%s4963_s4 + $0xa0] sm:$0xff] }
  0xb8   :  { %1996 = vperm.xlu1 %2788, %v1694_v22   ;;  %v1688_v22 = vld [vmem:[%s4963_s4 + $0x1a8] sm:$0xff] }
  0xbb   :  { %1751 = vperm.xlu0 %2787, %v1645_v23  }
  0xbc   :  { %1916 = vperm.xlu1 %2788, %v1678_v24   ;;  %v3526_v24 = vpop.permute.xlu1 %1328 }
  0xbd   :  { %5053 = vst [vmem:[#allocation24_spill] sm:$0xff] %v3526_v24  ;;  %v4967_v24 = vsub.s32 3, %v3384_v31 }
  0xbf   :  { %1538 = vperm.xlu0 %2787, %v1244_v25   ;;  %v3717_v8 = vrot.slane %v3398_v36, %v4967_v24 }
  0xc0   :  { %1826 = vperm.xlu1 %2788, %v1660_v26   ;;  %v1639_v26 = vld [vmem:[%s4963_s4 + $0x20] sm:$0xff] }
  0xc1   :  { %5081 = vst [vmem:[#allocation52_spill] sm:$0xff] %v3717_v8 }
  0xc3   :  { %1991 = vperm.xlu0 %2787, %v1693_v27   ;;  %v3533_v27 = vpop.permute.xlu0 %1333 }
  0xc4   :  { %1746 = vperm.xlu1 %2788, %v1644_v29   ;;  %5055 = vst [vmem:[#allocation26_spill] sm:$0xff] %v3533_v27  ;;  %v1672_v29 = vld [vmem:[%s4963_s4 + $0x128] sm:$0xff] }
  0xc7   :  { %1911 = vperm.xlu0 %2787, %v1677_v33  }
  0xc8   :  { %1533 = vperm.xlu1 %2788, %v1243_v34   ;;  %v3542_v34 = vpop.permute.xlu1 %1338 }
  0xc9   :  { %5056 = vst [vmem:[#allocation27_spill] sm:$0xff] %v3542_v34 }
  0xcb   :  { %1821 = vperm.xlu0 %2787, %v1659_v39   ;;  %v1654_v39 = vld [vmem:[%s4963_s4 + $0x98] sm:$0xff] }
  0xcc   :  { %1986 = vperm.xlu1 %2788, %v1692_v40   ;;  %v1687_v40 = vld [vmem:[%s4963_s4 + $0x1a0] sm:$0xff] }
  0xce   :  { %v3424_v45 = vpop.f32.mrf.mxu0 }
  0xcf   :  { %5041 = vst [vmem:[#allocation12_spill] sm:$0xff] %v3424_v45  ;;  %1741 = vperm.xlu0 %2787, %v1643_v42  }
  0xd0   :  { %v3426_v46 = vpop.f32.mrf.mxu0  ;;  %1906 = vperm.xlu1 %2788, %v1676_v44   ;;  %v3552_v44 = vpop.permute.xlu0 %1343 }
  0xd1   :  { %5042 = vst [vmem:[#allocation13_spill] sm:$0xff] %v3426_v46  ;;  %5057 = vst [vmem:[#allocation28_spill] sm:$0xff] %v3552_v44  ;;  %v2147_v44 = vld [vmem:[#allocation2] sm:$0x1] }
  0xd2   :  { %v3436_v50 = vpop.f32.mrf.mxu0 }
  0xd3   :  { %1528 = vperm.xlu0 %2787, %v1242_v48  }
  0xd4   :  { %v3440_v52 = vpop.f32.mrf.mxu0  ;;  %1816 = vperm.xlu1 %2788, %v1658_v49   ;;  %v1638_v49 = vld [vmem:[%s4963_s4 + $0x18] sm:$0xff] }
  0xd6   :  { %v3448_v55 = vpop.f32.mrf.mxu0 }
  0xd7   :  { %1981 = vperm.xlu0 %2787, %v1691_v53   ;;  %v1671_v53 = vld [vmem:[%s4963_s4 + $0x120] sm:$0xff] }
  0xd8   :  { %v3452_v57 = vpop.f32.mrf.mxu0  ;;  %1736 = vperm.xlu1 %2788, %v1642_v54  }
  0xda   :  { %v3462_v61 = vpop.f32.mrf.mxu0 }
  0xdb   :  { %1901 = vperm.xlu0 %2787, %v1675_v58   ;;  %v3564_v58 = vpop.permute.xlu1 %1348 }
  0xdc   :  { %v3464_v62 = vpop.f32.mrf.mxu0  ;;  %1523 = vperm.xlu1 %2788, %v1241_v60   ;;  %5058 = vst [vmem:[#allocation29_spill] sm:$0xff] %v3564_v58 }
  0xde   :  { %v3474_v2 = vpop.f32.mrf.mxu0 }
  0xdf   :  { %1811 = vperm.xlu0 %2787, %v1657_v0   ;;  %v1653_v0 = vld [vmem:[%s4963_s4 + $0x90] sm:$0xff] }
  0xe0   :  { %v3478_v4 = vpop.f32.mrf.mxu0  ;;  %1976 = vperm.xlu1 %2788, %v1690_v1   ;;  %v3571_v1 = vpop.permute.xlu0 %1353 }
  0xe1   :  { %5059 = vst [vmem:[#allocation30_spill] sm:$0xff] %v3571_v1 }
  0xe2   :  { %v3486_v7 = vpop.f32.mrf.mxu0 }
  0xe3   :  { %1731 = vperm.xlu0 %2787, %v1641_v5   ;;  %v1686_v5 = vld [vmem:[%s4963_s4 + $0x198] sm:$0xff] }
  0xe4   :  { %v3490_v9 = vpop.f32.mrf.mxu0  ;;  %1896 = vperm.xlu1 %2788, %v1674_v6  }
  0xe6   :  { %v3500_v13 = vpop.f32.mrf.mxu0 }
  0xe7   :  { %1806 = vperm.xlu0 %2787, %v1656_v10  }
  0xe8   :  { %v3502_v14 = vpop.f32.mrf.mxu0  ;;  %1971 = vperm.xlu1 %2788, %v1689_v12   ;;  %v3580_v12 = vpop.permute.xlu1 %1358 }
  0xe9   :  { %5060 = vst [vmem:[#allocation31_spill] sm:$0xff] %v3580_v12 }
  0xea   :  { %v3512_v18 = vpop.f32.mrf.mxu0 }
  0xeb   :  { %1726 = vperm.xlu0 %2787, %v1640_v16   ;;  %v1637_v16 = vld [vmem:[%s4963_s4 + $0x10] sm:$0xff] }
  0xec   :  { %v3516_v20 = vpop.f32.mrf.mxu0  ;;  %1891 = vperm.xlu1 %2788, %v1673_v17   ;;  %v1670_v17 = vld [vmem:[%s4963_s4 + $0x118] sm:$0xff] }
  0xee   :  { %v3524_v23 = vpop.f32.mrf.mxu0 }
  0xef   :  { %1801 = vperm.xlu0 %2787, %v1655_v21  }
  0xf0   :  { %v3528_v25 = vpop.f32.mrf.mxu0  ;;  %1966 = vperm.xlu1 %2788, %v1688_v22   ;;  %v3590_v22 = vpop.permute.xlu0 %1363 }
  0xf1   :  { %5054 = vst [vmem:[#allocation25_spill] sm:$0xff] %v3528_v25  ;;  %5062 = vst [vmem:[#allocation33_spill] sm:$0xff] %v3590_v22  ;;  %v1668_v22 = vld [vmem:[%s4963_s4 + $0x108] sm:$0xff] }
  0xf2   :  { %v3538_v30 = vpop.f32.mrf.mxu0 }
  0xf3   :  { %1721 = vperm.xlu0 %2787, %v1639_v26  }
  0xf4   :  { %v3540_v33 = vpop.f32.mrf.mxu0  ;;  %1886 = vperm.xlu1 %2788, %v1672_v29   ;;  %v1652_v29 = vld [vmem:[%s4963_s4 + $0x88] sm:$0xff] }
  0xf6   :  { %v3550_v42 = vpop.f32.mrf.mxu0 }
  0xf7   :  { %1796 = vperm.xlu0 %2787, %v1654_v39   ;;  %v1685_v39 = vld [vmem:[%s4963_s4 + $0x190] sm:$0xff] }
  0xf8   :  { %v3554_v48 = vpop.f32.mrf.mxu0  ;;  %1961 = vperm.xlu1 %2788, %v1687_v40  }
  0xfa   :  { %v3562_v54 = vpop.f32.mrf.mxu0 }
  0xfb   :  { %1716 = vperm.xlu0 %2787, %v1638_v49   ;;  %v3602_v49 = vpop.permute.xlu1 %1368 }
  0xfc   :  { %v3566_v60 = vpop.f32.mrf.mxu0  ;;  %1881 = vperm.xlu1 %2788, %v1671_v53   ;;  %5065 = vst [vmem:[#allocation36_spill] sm:$0xff] %v3602_v49 }
  0xfe   :  { %v3576_v6 = vpop.f32.mrf.mxu0 }
  0xff   :  { %1791 = vperm.xlu0 %2787, %v1653_v0   ;;  %v1636_v0 = vld [vmem:[%s4963_s4 + $0x8] sm:$0xff] }
 0x100   :  { %v3578_v10 = vpop.f32.mrf.mxu0  ;;  %1956 = vperm.xlu1 %2788, %v1686_v5   ;;  %v3609_v5 = vpop.permute.xlu0 %1373 }
 0x101   :  { %5067 = vst [vmem:[#allocation38_spill] sm:$0xff] %v3609_v5  ;;  %v1684_v5 = vld [vmem:[%s4963_s4 + $0x188] sm:$0xff] }
 0x102   :  { %v3588_v21 = vpop.f32.mrf.mxu0 }
 0x103   :  { %5061 = vst [vmem:[#allocation32_spill] sm:$0xff] %v3588_v21  ;;  %1711 = vperm.xlu0 %2787, %v1637_v16   ;;  %v1669_v16 = vld [vmem:[%s4963_s4 + $0x110] sm:$0xff] }
 0x104   :  { %v3592_v26 = vpop.f32.mrf.mxu0  ;;  %1876 = vperm.xlu1 %2788, %v1670_v17  }
 0x105   :  { %5063 = vst [vmem:[#allocation34_spill] sm:$0xff] %v3592_v26 }
 0x106   :  { %v3600_v40 = vpop.f32.mrf.mxu0 }
 0x107   :  { %5064 = vst [vmem:[#allocation35_spill] sm:$0xff] %v3600_v40  ;;  %1786 = vperm.xlu0 %2787, %v1652_v29   ;;  %v3620_v29 = vpop.permute.xlu1 %1378 }
 0x108   :  { %v3604_v53 = vpop.f32.mrf.mxu0  ;;  %1951 = vperm.xlu1 %2788, %v1685_v39   ;;  %5070 = vst [vmem:[#allocation41_spill] sm:$0xff] %v3620_v29  ;;  %v1651_v39 = vld [vmem:[%s4963_s4 + $0x80] sm:$0xff] }
 0x109   :  { %5066 = vst [vmem:[#allocation37_spill] sm:$0xff] %v3604_v53 }
 0x10a   :  { %v3614_v17 = vpop.f32.mrf.mxu0 }
 0x10b   :  { %5068 = vst [vmem:[#allocation39_spill] sm:$0xff] %v3614_v17  ;;  %2469 = vmatprep.subr.mxu1 %v3614_v17  ;;  %1706 = vperm.xlu0 %2787, %v1636_v0   ;;  %v3633_v0 = vpop.permute.xlu0 %1383 }
 0x10c   :  { %v3617_v35 = vpop.f32.mrf.mxu0  ;;  %2470 = vmatpush3.msra.mxu1 %v3512_v18  ;;  %1871 = vperm.xlu1 %2788, %v1669_v16   ;;  %5071 = vst [vmem:[#allocation42_spill] sm:$0xff] %v3633_v0  ;;  %v1635_v16 = vld [vmem:[%s4963_s4] sm:$0xff] }
 0x10d   :  { %5069 = vst [vmem:[#allocation40_spill] sm:$0xff] %v3617_v35  ;;  %2471 = vmatprep.subr.mxu1 %v3617_v35 }
 0x10e   :  { %v3629_v49 = vpop.f32.mrf.mxu0  ;;  %2472 = vmatpush3.msra.mxu1 %v3516_v20 }
 0x10f   :  { %2473 = vmatprep.subr.mxu1 %v3600_v40  ;;  %1781 = vperm.xlu0 %2787, %v1651_v39   ;;  %v3648_v39 = vpop.permute.xlu1 %1388  ;;  %v3658_v1 = vpop.permute.xlu0 %1393 }
 0x110   :  { %v3635_v29 = vpop.f32.mrf.mxu0  ;;  %2474 = vmatpush3.msra.mxu1 %v3500_v13  ;;  %1946 = vperm.xlu1 %2788, %v1684_v5   ;;  %5073 = vst [vmem:[#allocation44_spill] sm:$0xff] %v3648_v39  ;;  %v1683_v5 = vld [vmem:[%s4963_s4 + $0x180] sm:$0xff]  ;;  %5074 = vst [vmem:[#allocation45_spill] sm:$0xff] %v3658_v1 }
 0x111   :  { %2475 = vmatprep.subr.mxu1 %v3604_v53  ;;  %v1667_v39 = vld [vmem:[%s4963_s4 + $0x100] sm:$0xff] }
 0x112   :  { %v3645_v12 = vpop.f32.mrf.mxu0  ;;  %2476 = vmatpush3.msra.mxu1 %v3502_v14 }
 0x113   :  { %5072 = vst [vmem:[#allocation43_spill] sm:$0xff] %v3645_v12  ;;  %2477 = vmatprep.subr.mxu1 %v3588_v21  ;;  %1701 = vperm.xlu0 %2787, %v1635_v16   ;;  %v3677_v34 = vpop.permute.xlu0 %1403 }
 0x114   :  { %v3651_v0 = vpop.f32.mrf.mxu0  ;;  %2478 = vmatpush3.msra.mxu1 %v3486_v7  ;;  %1866 = vperm.xlu1 %2788, %v1668_v22   ;;  %v3670_v22 = vpop.permute.xlu1 %1398  ;;  %5077 = vst [vmem:[#allocation48_spill] sm:$0xff] %v3677_v34 }
 0x115   :  { %2479 = vmatprep.subr.mxu1 %v3592_v26  ;;  %5076 = vst [vmem:[#allocation47_spill] sm:$0xff] %v3670_v22 }
 0x116   :  { %v3663_v58 = vpop.f32.mrf.mxu0  ;;  %2480 = vmatpush3.msra.mxu1 %v3490_v9 }
 0x117   :  { %5075 = vst [vmem:[#allocation46_spill] sm:$0xff] %v3663_v58  ;;  %2481 = vmatprep.subr.mxu1 %v3576_v6  ;;  %1941 = vperm.xlu0 %2787, %v1683_v5  }
 0x118   :  { %v3667_v16 = vpop.f32.mrf.mxu0  ;;  %2482 = vmatpush3.msra.mxu1 %v3474_v2  ;;  %1861 = vperm.xlu1 %2788, %v1667_v39  }
 0x119   :  { %2483 = vmatprep.subr.mxu1 %v3578_v10 }
 0x11a   :  { %v3673_v1 = vpop.f32.mrf.mxu0  ;;  %2484 = vmatpush3.msra.mxu1 %v3478_v4 }
 0x11b   :  { %2485 = vmatprep.subr.mxu1 %v3562_v54  ;;  %2150 = vperm.xlu0 %2787, %v2147_v44   ;;  %v3696_v44 = vsub.s32 0, %v3384_v31 }
 0x11c   :  { %v3679_v5 = vpop.f32.mrf.mxu0  ;;  %2486 = vmatpush3.msra.mxu1 %v3462_v61 }
 0x11d   :  { %2487 = vmatprep.subr.mxu1 %v3566_v60  ;;  %5079 = vst [vmem:[#allocation50_spill] sm:$0xff] %v3696_v44  ;;  %v3709_v15 = vrot.slane %v3398_v36, %v3696_v44 }
 0x11e   :  { %v3683_v22 = vpop.f32.mrf.mxu0  ;;  %2488 = vmatpush3.msra.mxu1 %v3464_v62 }
 0x11f   :  { %2489 = vmatprep.subr.mxu1 %v3550_v42  ;;  %5080 = vst [vmem:[#allocation51_spill] sm:$0xff] %v3709_v15 }
 0x120   :  { %v3687_v39 = vpop.f32.mrf.mxu0  ;;  %2490 = vmatpush3.msra.mxu1 %v3448_v55 }
 0x121   :  { %5078 = vst [vmem:[#allocation49_spill] sm:$0xff] %v3687_v39  ;;  %2491 = vmatprep.subr.mxu1 %v3554_v48 }
 0x122   :  { %v3691_v34 = vpop.f32.mrf.mxu0  ;;  %2492 = vmatpush3.msra.mxu1 %v3452_v57 }
 0x123   :  { %2493 = vmatprep.subr.mxu1 %v3538_v30 }
 0x124   :  { %v3698_v27 = vpop.f32.mrf.mxu0  ;;  %2494 = vmatpush3.msra.mxu1 %v3436_v50 }
 0x125   :  { %2495 = vmatprep.subr.mxu1 %v3540_v33 }
 0x126   :  { %v3703_v19 = vpop.f32.mrf.mxu0  ;;  %2496 = vmatpush3.msra.mxu1 %v3440_v52 }
 0x127   :  { %2497 = vmatprep.subr.mxu1 %v3524_v23 }
 0x128   :  { %v3711_v11 = vpop.f32.mrf.mxu0  ;;  %2498 = vmatpush3.msra.mxu1 %v3424_v45 }
 0x129   :  { %2499 = vmatprep.subr.mxu1 %v3528_v25 }
 0x12a   :  { %v3720_v3 = vpop.f32.mrf.mxu0  ;;  %2500 = vmatpush3.msra.mxu1 %v3426_v46 }
 0x12b   :  { %5082 = vst [vmem:[#allocation53_spill] sm:$0xff] %v3720_v3  ;;  %766 = vmatmul.mubr.f32.vlgmr.msra.gmra.mxu1 %v3709_v15 }
 0x12c   :  { %v3724_v63 = vpop.f32.mrf.mxu0  ;;  %835 = vmatprep.mubr.f32.mxu1 %v3717_v8 }
 0x12e   :  { %v3727_v59 = vpop.f32.mrf.mxu0 }
 0x12f   :  { %5083 = vst [vmem:[#allocation54_spill] sm:$0xff] %v3727_v59 }
 0x130   :  { %v3729_v56 = vpop.f32.mrf.mxu0 }
 0x131   :  { %5084 = vst [vmem:[#allocation55_spill] sm:$0xff] %v3729_v56 }
 0x132   :  { %v3731_v51 = vpop.f32.mrf.mxu0 }
 0x133   :  { %5085 = vst [vmem:[#allocation56_spill] sm:$0xff] %v3731_v51 }
 0x134   :  { %v3733_v24 = vpop.f32.mrf.mxu0 }
 0x135   :  { %5086 = vst [vmem:[#allocation57_spill] sm:$0xff] %v3733_v24 }
 0x136   :  { %v3735_v47 = vpop.f32.mrf.mxu0 }
 0x137   :  { %5087 = vst [vmem:[#allocation58_spill] sm:$0xff] %v3735_v47 }
 0x138   :  { %v3737_v43 = vpop.f32.mrf.mxu0 }
 0x139   :  { %5088 = vst [vmem:[#allocation59_spill] sm:$0xff] %v3737_v43 }
 0x13a   :  { %v3739_v41 = vpop.f32.mrf.mxu0 }
 0x13b   :  { %5089 = vst [vmem:[#allocation60_spill] sm:$0xff] %v3739_v41 }
 0x13c   :  { %v3741_v32 = vpop.f32.mrf.mxu0 }
 0x13d   :  { %5090 = vst [vmem:[#allocation61_spill] sm:$0xff] %v3741_v32 }
 0x13e   :  { %v3743_v37 = vpop.f32.mrf.mxu0 }
 0x13f   :  { %5091 = vst [vmem:[#allocation62_spill] sm:$0xff] %v3743_v37 }
 0x140   :  { %v3745_v28 = vpop.f32.mrf.mxu0 }
 0x141   :  { %5092 = vst [vmem:[#allocation63_spill] sm:$0xff] %v3745_v28 }
 0x142   :  { %v3747_v44 = vpop.f32.mrf.mxu0 }
 0x143   :  { %5093 = vst [vmem:[#allocation64_spill] sm:$0xff] %v3747_v44 }
 0x144   :  { %v3749_v8 = vpop.f32.mrf.mxu0 }
 0x145   :  { %5094 = vst [vmem:[#allocation65_spill] sm:$0xff] %v3749_v8 }
 0x146   :  { %v3751_v15 = vpop.f32.mrf.mxu0 }
 0x147   :  { %5095 = vst [vmem:[#allocation66_spill] sm:$0xff] %v3751_v15 }
 0x148   :  { %v3753_v46 = vpop.f32.mrf.mxu0 }
 0x149   :  { %5096 = vst [vmem:[#allocation67_spill] sm:$0xff] %v3753_v46 }
 0x14a   :  { %v3755_v25 = vpop.f32.mrf.mxu0 }
 0x14b   :  { %5097 = vst [vmem:[#allocation68_spill] sm:$0xff] %v3755_v25  ;;  %2504 = vmatprep.subr.mxu1 %v3755_v25 }
 0x14c   :  { %v3758_v45 = vpop.f32.mrf.mxu0  ;;  %2505 = vmatpush3.msra.mxu1 %v3720_v3 }
 0x14d   :  { %5098 = vst [vmem:[#allocation69_spill] sm:$0xff] %v3758_v45  ;;  %2506 = vmatprep.subr.mxu1 %v3758_v45 }
 0x14e   :  { %2507 = vmatpush3.msra.mxu1 %v3724_v63 }
 0x14f   :  { %2508 = vmatprep.subr.mxu1 %v3751_v15 }
 0x150   :  { %2509 = vmatpush3.msra.mxu1 %v3703_v19 }
 0x151   :  { %2510 = vmatprep.subr.mxu1 %v3753_v46 }
 0x152   :  { %2511 = vmatpush3.msra.mxu1 %v3711_v11 }
 0x153   :  { %2512 = vmatprep.subr.mxu1 %v3747_v44 }
 0x154   :  { %2513 = vmatpush3.msra.mxu1 %v3691_v34 }
 0x155   :  { %2514 = vmatprep.subr.mxu1 %v3749_v8 }
 0x156   :  { %2515 = vmatpush3.msra.mxu1 %v3698_v27 }
 0x157   :  { %2516 = vmatprep.subr.mxu1 %v3743_v37 }
 0x158   :  { %2517 = vmatpush3.msra.mxu1 %v3683_v22 }
 0x159   :  { %2518 = vmatprep.subr.mxu1 %v3745_v28 }
 0x15a   :  { %2519 = vmatpush3.msra.mxu1 %v3687_v39  ;;  %v4988_v39 = vsub.s32 2, %v3384_v31 }
 0x15b   :  { %2520 = vmatprep.subr.mxu1 %v3739_v41 }
 0x15c   :  { %2521 = vmatpush3.msra.mxu1 %v3673_v1 }
 0x15d   :  { %2522 = vmatprep.subr.mxu1 %v3741_v32 }
 0x15e   :  { %2523 = vmatpush3.msra.mxu1 %v3679_v5 }
 0x15f   :  { %2524 = vmatprep.subr.mxu1 %v3735_v47 }
 0x160   :  { %2525 = vmatpush3.msra.mxu1 %v3663_v58  ;;  %v3792_v58 = vrot.slane %v3398_v36, %v4988_v39  ;;  %v855_v36 = vmul.f32 %v3516_v20, %v3516_v20  ;;  %v870_v39 = vmul.f32 %v3600_v40, %v3600_v40 }
 0x161   :  { %2526 = vmatprep.subr.mxu1 %v3737_v43 }
 0x162   :  { %2527 = vmatpush3.msra.mxu1 %v3667_v16 }
 0x163   :  { %2528 = vmatprep.subr.mxu1 %v3731_v51  ;;  %v872_v51 = vmul.f32 %v3614_v17, %v3614_v17  ;;  %v854_v17 = vmul.f32 %v3500_v13, %v3500_v13 }
 0x164   :  { %2529 = vmatpush3.msra.mxu1 %v3645_v12  ;;  %v856_v12 = vmul.f32 %v3512_v18, %v3512_v18 }
 0x165   :  { %2530 = vmatprep.subr.mxu1 %v3733_v24 }
 0x166   :  { %2531 = vmatpush3.msra.mxu1 %v3651_v0 }
 0x167   :  { %2532 = vmatprep.subr.mxu1 %v3727_v59  ;;  %v871_v59 = vmul.f32 %v3617_v35, %v3617_v35  ;;  %v869_v35 = vmul.f32 %v3604_v53, %v3604_v53 }
 0x168   :  { %2533 = vmatpush3.msra.mxu1 %v3629_v49 }
 0x169   :  { %2534 = vmatprep.subr.mxu1 %v3729_v56 }
 0x16a   :  { %2535 = vmatpush3.msra.mxu1 %v3635_v29 }
 0x16b   :  { %836 = vmatmul.mubr.f32.vlgmr.msra.gmra.mxu1 %v3792_v58  ;;  %2539 = vmatprep.subr.mxu1 %v872_v51  ;;  %v853_v51 = vmul.f32 %v3502_v14, %v3502_v14 }
 0x16c   :  { %2540 = vmatpush3.msra.mxu1 %v856_v12  ;;  %969 = vmatprep.mubr.f32.mxu1 %v3405_v38  ;;  %v868_v12 = vmul.f32 %v3588_v21, %v3588_v21  ;;  %v852_v38 = vmul.f32 %v3486_v7, %v3486_v7 }
 0x16d   :  { %2541 = vmatprep.subr.mxu1 %v871_v59  ;;  %v867_v59 = vmul.f32 %v3592_v26, %v3592_v26  ;;  %v5103_v26 = vld [vmem:[#allocation52_spill] sm:$0xff] }
 0x16e   :  { %2542 = vmatpush3.msra.mxu1 %v855_v36  ;;  %v851_v36 = vmul.f32 %v3490_v9, %v3490_v9 }
 0x16f   :  { %2543 = vmatprep.subr.mxu1 %v870_v39  ;;  %v866_v39 = vmul.f32 %v3576_v6, %v3576_v6 }
 0x170   :  { %2544 = vmatpush3.msra.mxu1 %v854_v17  ;;  %v850_v17 = vmul.f32 %v3474_v2, %v3474_v2 }
 0x171   :  { %2545 = vmatprep.subr.mxu1 %v869_v35  ;;  %v865_v35 = vmul.f32 %v3578_v10, %v3578_v10 }
 0x172   :  { %2546 = vmatpush3.msra.mxu1 %v853_v51  ;;  %v849_v51 = vmul.f32 %v3478_v4, %v3478_v4 }
 0x173   :  { %2547 = vmatprep.subr.mxu1 %v868_v12  ;;  %v864_v12 = vmul.f32 %v3562_v54, %v3562_v54 }
 0x174   :  { %2548 = vmatpush3.msra.mxu1 %v852_v38  ;;  %v848_v38 = vmul.f32 %v3462_v61, %v3462_v61 }
 0x175   :  { %2549 = vmatprep.subr.mxu1 %v867_v59  ;;  %v863_v59 = vmul.f32 %v3566_v60, %v3566_v60 }
 0x176   :  { %2550 = vmatpush3.msra.mxu1 %v851_v36  ;;  %v847_v36 = vmul.f32 %v3464_v62, %v3464_v62 }
 0x177   :  { %2551 = vmatprep.subr.mxu1 %v866_v39  ;;  %v862_v39 = vmul.f32 %v3550_v42, %v3550_v42 }
 0x178   :  { %2552 = vmatpush3.msra.mxu1 %v850_v17  ;;  %v846_v17 = vmul.f32 %v3448_v55, %v3448_v55 }
 0x179   :  { %2553 = vmatprep.subr.mxu1 %v865_v35  ;;  %v861_v35 = vmul.f32 %v3554_v48, %v3554_v48 }
 0x17a   :  { %2554 = vmatpush3.msra.mxu1 %v849_v51  ;;  %v845_v51 = vmul.f32 %v3452_v57, %v3452_v57 }
 0x17b   :  { %2555 = vmatprep.subr.mxu1 %v864_v12  ;;  %v860_v12 = vmul.f32 %v3538_v30, %v3538_v30 }
 0x17c   :  { %2556 = vmatpush3.msra.mxu1 %v848_v38  ;;  %v844_v38 = vmul.f32 %v3436_v50, %v3436_v50 }
 0x17d   :  { %2557 = vmatprep.subr.mxu1 %v863_v59  ;;  %v859_v59 = vmul.f32 %v3540_v33, %v3540_v33 }
 0x17e   :  { %2558 = vmatpush3.msra.mxu1 %v847_v36  ;;  %v843_v36 = vmul.f32 %v3440_v52, %v3440_v52 }
 0x17f   :  { %2559 = vmatprep.subr.mxu1 %v862_v39  ;;  %v858_v39 = vmul.f32 %v3524_v23, %v3524_v23 }
 0x180   :  { %2560 = vmatpush3.msra.mxu1 %v846_v17  ;;  %v5099_v17 = vld [vmem:[#allocation12_spill] sm:$0xff] }
 0x181   :  { %2561 = vmatprep.subr.mxu1 %v861_v35  ;;  %v842_v40 = vmul.f32 %v5099_v17, %v5099_v17  ;;  %v5100_v35 = vld [vmem:[#allocation25_spill] sm:$0xff] }
 0x182   :  { %2562 = vmatpush3.msra.mxu1 %v845_v51  ;;  %v857_v53 = vmul.f32 %v5100_v35, %v5100_v35  ;;  %v5101_v51 = vld [vmem:[#allocation13_spill] sm:$0xff] }
 0x183   :  { %2563 = vmatprep.subr.mxu1 %v860_v12  ;;  %v841_v21 = vmul.f32 %v5101_v51, %v5101_v51  ;;  %v904_v12 = vmul.f32 %v3755_v25, %v3755_v25 }
 0x184   :  { %2564 = vmatpush3.msra.mxu1 %v844_v38  ;;  %v888_v38 = vmul.f32 %v3720_v3, %v3720_v3 }
 0x185   :  { %2565 = vmatprep.subr.mxu1 %v859_v59  ;;  %v903_v59 = vmul.f32 %v3758_v45, %v3758_v45 }
 0x186   :  { %2566 = vmatpush3.msra.mxu1 %v843_v36  ;;  %v5102_v36 = vld [vmem:[#allocation51_spill] sm:$0xff] }
 0x187   :  { %2567 = vmatprep.subr.mxu1 %v858_v39  ;;  %v887_v39 = vmul.f32 %v3724_v63, %v3724_v63 }
 0x188   :  { %2568 = vmatpush3.msra.mxu1 %v842_v40  ;;  %v902_v40 = vmul.f32 %v3751_v15, %v3751_v15 }
 0x189   :  { %2569 = vmatprep.subr.mxu1 %v857_v53  ;;  %v886_v53 = vmul.f32 %v3703_v19, %v3703_v19 }
 0x18a   :  { %2570 = vmatpush3.msra.mxu1 %v841_v21  ;;  %v901_v21 = vmul.f32 %v3753_v46, %v3753_v46 }
 0x18b   :  { %970 = vmatmul.mubr.f32.vlgmr.msra.gmra.mxu1 %v5102_v36  ;;  %2574 = vmatprep.subr.mxu1 %v904_v12  ;;  %v885_v12 = vmul.f32 %v3711_v11, %v3711_v11  ;;  %v883_v36 = vmul.f32 %v3698_v27, %v3698_v27 }
 0x18c   :  { %2575 = vmatpush3.msra.mxu1 %v888_v38  ;;  %1039 = vmatprep.mubr.f32.mxu1 %v5103_v26  ;;  %v900_v38 = vmul.f32 %v3747_v44, %v3747_v44  ;;  %v884_v26 = vmul.f32 %v3691_v34, %v3691_v34 }
 0x18d   :  { %2576 = vmatprep.subr.mxu1 %v903_v59  ;;  %v899_v59 = vmul.f32 %v3749_v8, %v3749_v8 }
 0x18e   :  { %2577 = vmatpush3.msra.mxu1 %v887_v39  ;;  %v898_v39 = vmul.f32 %v3743_v37, %v3743_v37 }
 0x18f   :  { %2578 = vmatprep.subr.mxu1 %v902_v40  ;;  %v882_v40 = vmul.f32 %v3683_v22, %v3683_v22 }
 0x190   :  { %2579 = vmatpush3.msra.mxu1 %v886_v53  ;;  %v897_v53 = vmul.f32 %v3745_v28, %v3745_v28 }
 0x191   :  { %2580 = vmatprep.subr.mxu1 %v901_v21  ;;  %v5104_v21 = vld [vmem:[#allocation49_spill] sm:$0xff] }
 0x192   :  { %2581 = vmatpush3.msra.mxu1 %v885_v12  ;;  %v881_v12 = vmul.f32 %v5104_v21, %v5104_v21 }
 0x193   :  { %2582 = vmatprep.subr.mxu1 %v900_v38  ;;  %v896_v38 = vmul.f32 %v3739_v41, %v3739_v41 }
 0x194   :  { %2583 = vmatpush3.msra.mxu1 %v884_v26  ;;  %v880_v26 = vmul.f32 %v3673_v1, %v3673_v1 }
 0x195   :  { %2584 = vmatprep.subr.mxu1 %v899_v59  ;;  %v895_v59 = vmul.f32 %v3741_v32, %v3741_v32 }
 0x196   :  { %2585 = vmatpush3.msra.mxu1 %v883_v36  ;;  %v879_v36 = vmul.f32 %v3679_v5, %v3679_v5 }
 0x197   :  { %2586 = vmatprep.subr.mxu1 %v898_v39  ;;  %v894_v39 = vmul.f32 %v3735_v47, %v3735_v47 }
 0x198   :  { %2587 = vmatpush3.msra.mxu1 %v882_v40  ;;  %v5105_v40 = vld [vmem:[#allocation46_spill] sm:$0xff] }
 0x199   :  { %2588 = vmatprep.subr.mxu1 %v897_v53  ;;  %v878_v25 = vmul.f32 %v5105_v40, %v5105_v40  ;;  %v893_v53 = vmul.f32 %v3737_v43, %v3737_v43 }
 0x19a   :  { %2589 = vmatpush3.msra.mxu1 %v881_v12  ;;  %v877_v12 = vmul.f32 %v3667_v16, %v3667_v16 }
 0x19b   :  { %2590 = vmatprep.subr.mxu1 %v896_v38  ;;  %v5106_v38 = vld [vmem:[#allocation56_spill] sm:$0xff] }
 0x19c   :  { %2591 = vmatpush3.msra.mxu1 %v880_v26  ;;  %v892_v45 = vmul.f32 %v5106_v38, %v5106_v38  ;;  %v5107_v26 = vld [vmem:[#allocation43_spill] sm:$0xff] }
 0x19d   :  { %2592 = vmatprep.subr.mxu1 %v895_v59  ;;  %v876_v15 = vmul.f32 %v5107_v26, %v5107_v26  ;;  %v891_v59 = vmul.f32 %v3733_v24, %v3733_v24 }
 0x19e   :  { %2593 = vmatpush3.msra.mxu1 %v879_v36  ;;  %v875_v36 = vmul.f32 %v3651_v0, %v3651_v0 }
 0x19f   :  { %2594 = vmatprep.subr.mxu1 %v894_v39  ;;  %v5108_v39 = vld [vmem:[#allocation54_spill] sm:$0xff] }
 0x1a0   :  { %2595 = vmatpush3.msra.mxu1 %v878_v25  ;;  %v890_v46 = vmul.f32 %v5108_v39, %v5108_v39  ;;  %v874_v25 = vmul.f32 %v3629_v49, %v3629_v49 }
 0x1a1   :  { %2596 = vmatprep.subr.mxu1 %v893_v53  ;;  %v889_v53 = vmul.f32 %v3729_v56, %v3729_v56 }
 0x1a2   :  { %2597 = vmatpush3.msra.mxu1 %v877_v12  ;;  %v873_v12 = vmul.f32 %v3635_v29, %v3635_v29 }
 0x1a3   :  { %2598 = vmatprep.subr.mxu1 %v892_v45  ;;  %v3930_v45 = vpop.permute.xlu1 %1408 }
 0x1a4   :  { %2599 = vmatpush3.msra.mxu1 %v876_v15  ;;  %5109 = vst [vmem:[#allocation12_spill] sm:$0xff] %v3930_v45  ;;  %v3932_v15 = vpop.permute.xlu0 %1413 }
 0x1a5   :  { %2600 = vmatprep.subr.mxu1 %v891_v59  ;;  %5110 = vst [vmem:[#allocation25_spill] sm:$0xff] %v3932_v15 }
 0x1a6   :  { %2601 = vmatpush3.msra.mxu1 %v875_v36 }
 0x1a7   :  { %2602 = vmatprep.subr.mxu1 %v890_v46  ;;  %v3934_v59 = vpop.permute.xlu1 %1418 }
 0x1a8   :  { %2603 = vmatpush3.msra.mxu1 %v874_v25  ;;  %5111 = vst [vmem:[#allocation13_spill] sm:$0xff] %v3934_v59  ;;  %v3936_v44 = vpop.permute.xlu0 %1423 }
 0x1a9   :  { %2604 = vmatprep.subr.mxu1 %v889_v53  ;;  %5112 = vst [vmem:[#allocation51_spill] sm:$0xff] %v3936_v44 }
 0x1aa   :  { %2605 = vmatpush3.msra.mxu1 %v873_v12 }
 0x1ab   :  { %1040 = vmatmul.mubr.f32.vlgmr.msra.gmra.mxu1 %v3792_v58  ;;  %v3938_v36 = vpop.permute.xlu1 %1428 }
 0x1ac   :  { %5113 = vst [vmem:[#allocation52_spill] sm:$0xff] %v3938_v36  ;;  %v3940_v8 = vpop.permute.xlu0 %1433 }
 0x1ad   :  { %5114 = vst [vmem:[#allocation49_spill] sm:$0xff] %v3940_v8 }
 0x1af   :  { %v3942_v46 = vpop.permute.xlu1 %1438 }
 0x1b0   :  { %5115 = vst [vmem:[#allocation46_spill] sm:$0xff] %v3942_v46  ;;  %v3944_v37 = vpop.permute.xlu0 %1443 }
 0x1b1   :  { %5116 = vst [vmem:[#allocation43_spill] sm:$0xff] %v3944_v37 }
 0x1b3   :  { %v3946_v25 = vpop.permute.xlu1 %1448 }
 0x1b4   :  { %5117 = vst [vmem:[#allocation70_spill] sm:$0xff] %v3946_v25  ;;  %v3948_v53 = vpop.permute.xlu0 %1453 }
 0x1b5   :  { %5118 = vst [vmem:[#allocation71_spill] sm:$0xff] %v3948_v53 }
 0x1b7   :  { %v3950_v58 = vpop.permute.xlu1 %1458 }
 0x1b8   :  { %5119 = vst [vmem:[#allocation72_spill] sm:$0xff] %v3950_v58  ;;  %v3952_v12 = vpop.permute.xlu0 %1463 }
 0x1b9   :  { %5120 = vst [vmem:[#allocation73_spill] sm:$0xff] %v3952_v12 }
 0x1bb   :  { %v3954_v15 = vpop.permute.xlu1 %1468 }
 0x1bc   :  { %5121 = vst [vmem:[#allocation74_spill] sm:$0xff] %v3954_v15  ;;  %v3956_v59 = vpop.permute.xlu0 %1473 }
 0x1bd   :  { %5122 = vst [vmem:[#allocation75_spill] sm:$0xff] %v3956_v59 }
 0x1bf   :  { %v3958_v44 = vpop.permute.xlu1 %1478 }
 0x1c0   :  { %5123 = vst [vmem:[#allocation76_spill] sm:$0xff] %v3958_v44  ;;  %v3960_v36 = vpop.permute.xlu0 %1483 }
 0x1c1   :  { %5124 = vst [vmem:[#allocation77_spill] sm:$0xff] %v3960_v36 }
 0x1c3   :  { %v3962_v8 = vpop.permute.xlu1 %1488 }
 0x1c4   :  { %5125 = vst [vmem:[#allocation78_spill] sm:$0xff] %v3962_v8  ;;  %v3964_v46 = vpop.permute.xlu0 %1493 }
 0x1c5   :  { %5126 = vst [vmem:[#allocation79_spill] sm:$0xff] %v3964_v46 }
 0x1c7   :  { %v3966_v37 = vpop.permute.xlu1 %1498 }
 0x1c8   :  { %5127 = vst [vmem:[#allocation80_spill] sm:$0xff] %v3966_v37  ;;  %v3968_v25 = vpop.permute.xlu0 %1503 }
 0x1c9   :  { %5128 = vst [vmem:[#allocation81_spill] sm:$0xff] %v3968_v25 }
 0x1cb   :  { %v3970_v53 = vpop.permute.xlu1 %1508 }
 0x1cc   :  { %5129 = vst [vmem:[#allocation82_spill] sm:$0xff] %v3970_v53  ;;  %v3972_v58 = vpop.permute.xlu0 %1513 }
 0x1cd   :  { %5130 = vst [vmem:[#allocation83_spill] sm:$0xff] %v3972_v58 }
 0x1cf   :  { %v3974_v12 = vpop.permute.xlu1 %1518 }
 0x1d0   :  { %5131 = vst [vmem:[#allocation84_spill] sm:$0xff] %v3974_v12  ;;  %v3976_v15 = vpop.permute.xlu0 %1568 }
 0x1d1   :  { %5132 = vst [vmem:[#allocation85_spill] sm:$0xff] %v3976_v15 }
 0x1d3   :  { %v3978_v59 = vpop.permute.xlu1 %1856 }
 0x1d4   :  { %5133 = vst [vmem:[#allocation86_spill] sm:$0xff] %v3978_v59  ;;  %v3980_v44 = vpop.permute.xlu0 %1776 }
 0x1d5   :  { %5134 = vst [vmem:[#allocation87_spill] sm:$0xff] %v3980_v44 }
 0x1d7   :  { %v3982_v36 = vpop.permute.xlu1 %1563 }
 0x1d8   :  { %5135 = vst [vmem:[#allocation88_spill] sm:$0xff] %v3982_v36  ;;  %v3984_v8 = vpop.permute.xlu0 %1851 }
 0x1d9   :  { %5136 = vst [vmem:[#allocation89_spill] sm:$0xff] %v3984_v8 }
 0x1db   :  { %v3986_v46 = vpop.permute.xlu1 %2016 }
 0x1dc   :  { %5137 = vst [vmem:[#allocation90_spill] sm:$0xff] %v3986_v46  ;;  %v3988_v37 = vpop.permute.xlu0 %1771 }
 0x1dd   :  { %5138 = vst [vmem:[#allocation91_spill] sm:$0xff] %v3988_v37 }
 0x1df   :  { %v3990_v25 = vpop.permute.xlu1 %1936 }
 0x1e0   :  { %5139 = vst [vmem:[#allocation92_spill] sm:$0xff] %v3990_v25  ;;  %v3992_v53 = vpop.permute.xlu0 %1558 }
 0x1e1   :  { %5140 = vst [vmem:[#allocation93_spill] sm:$0xff] %v3992_v53 }
 0x1e3   :  { %v3994_v58 = vpop.permute.xlu1 %1846 }
 0x1e4   :  { %5141 = vst [vmem:[#allocation94_spill] sm:$0xff] %v3994_v58  ;;  %v3996_v12 = vpop.permute.xlu0 %2011 }
 0x1e5   :  { %5142 = vst [vmem:[#allocation95_spill] sm:$0xff] %v3996_v12 }
 0x1e7   :  { %v3998_v15 = vpop.permute.xlu1 %1766 }
 0x1e8   :  { %5143 = vst [vmem:[#allocation96_spill] sm:$0xff] %v3998_v15  ;;  %v4000_v59 = vpop.permute.xlu0 %1931 }
 0x1e9   :  { %5144 = vst [vmem:[#allocation97_spill] sm:$0xff] %v4000_v59 }
 0x1eb   :  { %v4002_v44 = vpop.permute.xlu1 %1553 }
 0x1ec   :  { %5145 = vst [vmem:[#allocation98_spill] sm:$0xff] %v4002_v44  ;;  %v4004_v36 = vpop.permute.xlu0 %1841 }
 0x1ed   :  { %5146 = vst [vmem:[#allocation99_spill] sm:$0xff] %v4004_v36 }
 0x1ef   :  { %v4006_v8 = vpop.permute.xlu1 %2006 }
 0x1f0   :  { %5147 = vst [vmem:[#allocation100_spill] sm:$0xff] %v4006_v8  ;;  %v4008_v46 = vpop.permute.xlu0 %1761 }
 0x1f1   :  { %5148 = vst [vmem:[#allocation101_spill] sm:$0xff] %v4008_v46 }
 0x1f3   :  { %v4010_v37 = vpop.permute.xlu1 %1926 }
 0x1f4   :  { %5149 = vst [vmem:[#allocation102_spill] sm:$0xff] %v4010_v37  ;;  %v4012_v25 = vpop.permute.xlu0 %1548 }
 0x1f5   :  { %5150 = vst [vmem:[#allocation103_spill] sm:$0xff] %v4012_v25 }
 0x1f7   :  { %v4014_v53 = vpop.permute.xlu1 %1836 }
 0x1f8   :  { %5151 = vst [vmem:[#allocation104_spill] sm:$0xff] %v4014_v53  ;;  %v4016_v58 = vpop.permute.xlu0 %2001 }
 0x1f9   :  { %5152 = vst [vmem:[#allocation105_spill] sm:$0xff] %v4016_v58  ;;  %v2501_v58 = vpop.f32.mrf.mxu1 }
 0x1fb   :  { %v4018_v12 = vpop.permute.xlu1 %1756 }
 0x1fc   :  { %5153 = vst [vmem:[#allocation106_spill] sm:$0xff] %v4018_v12  ;;  %v4020_v15 = vpop.permute.xlu0 %1921 }
 0x1fd   :  { %5154 = vst [vmem:[#allocation107_spill] sm:$0xff] %v4020_v15  ;;  %v2502_v15 = vpop.f32.mrf.mxu1 }
 0x1ff   :  { %v4022_v59 = vpop.permute.xlu1 %1543 }
 0x200   :  { %5155 = vst [vmem:[#allocation108_spill] sm:$0xff] %v4022_v59  ;;  %v4024_v44 = vpop.permute.xlu0 %1831  ;;  %v4043_v59 = vld [vmem:[%s4961_s2 + $0x1] ss:$2 sm:$0xf]  ;;  %s2814_s2 = smov [#allocation3]  }
 0x201   :  { %5156 = vst [vmem:[#allocation109_spill] sm:$0xff] %v4024_v44  ;;  %5164 = vst [vmem:[#allocation117_spill] sm:$0xff] %v4043_v59  ;;  %s2326_s21 = sshll.u32 %s2814_s2, 4  ;;  %s2327_s21 = int_to_ptr.vmem [resolvable:$true] %s2326_s21 }
 0x202   :  { %s2791_s22 = scalar_lea.vmem %s2327_s21, 16  ;;  %s2795_s23 = scalar_lea.vmem %s2327_s21, 32 }
 0x203   :  { %v4026_v36 = vpop.permute.xlu1 %1996  ;;  %p2792_p0 = scmp.ne.s32.totalorder %s2327_s21, %s2791_s22  ;;  %p2796_p1 = scmp.lt.s32.totalorder %s2327_s21, %s2327_s21 }
 0x204   :  { %5157 = vst [vmem:[#allocation110_spill] sm:$0xff] %v4026_v36  ;;  %v4028_v8 = vpop.permute.xlu0 %1751  ;;  %v5165_v36 = vsub.s32 1, %v3384_v31  ;;  %p2797_p2 = scmp.lt.s32.totalorder %s2795_s23, %s2791_s22 }
 0x205   :  { %5158 = vst [vmem:[#allocation111_spill] sm:$0xff] %v4028_v8 }
 0x206   :  { %v2165_v8 = vrot.slane %v4043_v59, %v5165_v36  ;;  %p2798_p3 = por %p2797_p2, %p2796_p1 }
 0x207   :  { %v4030_v46 = vpop.permute.xlu1 %1916 }
 0x208   :  { %5159 = vst [vmem:[#allocation112_spill] sm:$0xff] %v4030_v46  ;;  %v4032_v37 = vpop.permute.xlu0 %1538  ;;  %v5166_v46 = vsub.s32 3, %v3384_v31  ;;  %2242 = vmatprep.mubr.f32.mxu0 %v2165_v8  ;;  %v2503_v8 = vadd.f32 %v2502_v15, %v2501_v58  ;;  %p2799_p4 = pnand %p2798_p3, %p2792_p0 }
 0x209   :  { %5160 = vst [vmem:[#allocation113_spill] sm:$0xff] %v4032_v37 }
 0x20a   :  { %v2173_v44 = vrot.slane %v4043_v59, %v5166_v46 }
 0x20b   :  { %v4034_v25 = vpop.permute.xlu1 %1826 }
 0x20c   :  { %5161 = vst [vmem:[#allocation114_spill] sm:$0xff] %v4034_v25  ;;  %v4036_v53 = vpop.permute.xlu0 %1991  ;;  %2312 = vmatprep.mubr.f32.mxu1 %v2173_v44 }
 0x20d   :  { %5162 = vst [vmem:[#allocation115_spill] sm:$0xff] %v4036_v53 }
 0x20f   :  { %v4038_v12 = vpop.permute.xlu1 %1746 }
 0x210   :  { %5163 = vst [vmem:[#allocation116_spill] sm:$0xff] %v4038_v12  ;;  %v4051_v25 = vpop.permute.xlu0 %1911 }
 0x211   :  { %5167 = vst [vmem:[#allocation118_spill] sm:$0xff] %v4051_v25 }
 0x213   :  { %v4053_v12 = vpop.permute.xlu1 %1533 }
 0x214   :  { %5168 = vst [vmem:[#allocation119_spill] sm:$0xff] %v4053_v12  ;;  %v4055_v45 = vpop.permute.xlu0 %1821 }
 0x215   :  { %5169 = vst [vmem:[#allocation120_spill] sm:$0xff] %v4055_v45 }
 0x217   :  { %v4057_v41 = vpop.permute.xlu1 %1986 }
 0x218   :  { %5170 = vst [vmem:[#allocation121_spill] sm:$0xff] %v4057_v41  ;;  %v4059_v47 = vpop.permute.xlu0 %1741 }
 0x219   :  { %5171 = vst [vmem:[#allocation122_spill] sm:$0xff] %v4059_v47 }
 0x21b   :  { %v4061_v31 = vpop.permute.xlu1 %1906 }
 0x21c   :  { %5172 = vst [vmem:[#allocation123_spill] sm:$0xff] %v4061_v31  ;;  %v4063_v25 = vpop.permute.xlu0 %1528 }
 0x21d   :  { %5173 = vst [vmem:[#allocation124_spill] sm:$0xff] %v4063_v25 }
 0x21f   :  { %v4065_v43 = vpop.permute.xlu1 %1816 }
 0x220   :  { %5174 = vst [vmem:[#allocation125_spill] sm:$0xff] %v4065_v43  ;;  %v4067_v24 = vpop.permute.xlu0 %1981 }
 0x221   :  { %5175 = vst [vmem:[#allocation126_spill] sm:$0xff] %v4067_v24 }
 0x223   :  { %v4069_v39 = vpop.permute.xlu1 %1736 }
 0x224   :  { %5176 = vst [vmem:[#allocation127_spill] sm:$0xff] %v4069_v39  ;;  %v4071_v3 = vpop.permute.xlu0 %1901 }
 0x225   :  { %5177 = vst [vmem:[#allocation128_spill] sm:$0xff] %v4071_v3  ;;  %v5191_v3 = vld [vmem:[#allocation39_spill] sm:$0xff] }
 0x228   :  { %v4075_v15 = vpop.permute.xlu0 %1811 }
 0x229   :  { %5179 = vst [vmem:[#allocation130_spill] sm:$0xff] %v4075_v15 }
 0x22b   :  { %v2536_v53 = vpop.f32.mrf.mxu1 }
 0x22d   :  { %v2537_v37 = vpop.f32.mrf.mxu1 }
 0x22e   :  { %v2538_v59 = vadd.f32 %v2537_v37, %v2536_v53  ;;  %v4073_v37 = vpop.permute.xlu1 %1523 }
 0x22f   :  { %5178 = vst [vmem:[#allocation129_spill] sm:$0xff] %v4073_v37 }
 0x230   :  { %v838_v12 = vadd.f32 %v2538_v59, %v2503_v8  ;;  %v5181_v59 = vld [vmem:[#allocation50_spill] sm:$0xff] }
 0x231   :  { %v5185_v8 = vld [vmem:[#allocation34_spill] sm:$0xff] }
 0x232   :  { %v1045_v41 = vmul.f32 0.001953125, %v838_v12  ;;  %v4077_v58 = vpop.permute.xlu1 %1976 }
 0x233   :  { %5180 = vst [vmem:[#allocation131_spill] sm:$0xff] %v4077_v58 }
 0x234   :  { %v1047_v56 = vmul.f32 %v1045_v41, %v1045_v41 }
 0x236   :  { %v4096_v12 = vpop.permute.xlu1 %1896 }
 0x237   :  { %5183 = vst [vmem:[#allocation133_spill] sm:$0xff] %v4096_v12  ;;  %v5207_v12 = vld [vmem:[#allocation67_spill] sm:$0xff] }
 0x23a   :  { %v4148_v58 = vpop.permute.xlu1 %1971 }
 0x23b   :  { %5189 = vst [vmem:[#allocation34_spill] sm:$0xff] %v4148_v58  ;;  %v5208_v58 = vld [vmem:[#allocation66_spill] sm:$0xff] }
 0x23e   :  { %v4201_v37 = vpop.permute.xlu1 %1891 }
 0x24b   :  { %v2571_v28 = vpop.f32.mrf.mxu1 }
 0x24d   :  { %v2572_v32 = vpop.f32.mrf.mxu1 }
 0x24e   :  { %v2573_v38 = vadd.f32 %v2572_v32, %v2571_v28  ;;  %v4080_v28 = vrot.slane %v1045_v41, %v5181_v59  ;;  %v4082_v32 = vpop.permute.xlu0 %1731  ;;  %v5209_v41 = vld [vmem:[#allocation69_spill] sm:$0xff] }
 0x24f   :  { %5182 = vst [vmem:[#allocation132_spill] sm:$0xff] %v4082_v32 }
 0x250   :  { %v5214_v15 = vsub.f32 %v3440_v52, %v4080_v28  ;;  %v5215_v43 = vsub.f32 %v3436_v50, %v4080_v28  ;;  %v5218_v52 = vsub.f32 %v3448_v55, %v4080_v28  ;;  %v5219_v50 = vsub.f32 %v3464_v62, %v4080_v28 }
 0x251   :  { %v5229_v25 = vsub.f32 %v3512_v18, %v4080_v28 }
 0x26b   :  { %v2606_v36 = vpop.f32.mrf.mxu1 }
 0x26d   :  { %v2607_v46 = vpop.f32.mrf.mxu1 }
 0x26e   :  { %v2608_v44 = vadd.f32 %v2607_v46, %v2606_v36 }
 0x270   :  { %v1042_v45 = vadd.f32 %v2608_v44, %v2573_v38  ;;  %v5188_v44 = vld [vmem:[#allocation35_spill] sm:$0xff]  ;;  %v5213_v38 = vsub.f32 %v5099_v17, %v4080_v28  ;;  %v5217_v17 = vsub.f32 %v3452_v57, %v4080_v28 }
 0x272   :  { %v1046_v47 = vmul.f32 0.001953125, %v1042_v45  ;;  %v5187_v45 = vld [vmem:[#allocation37_spill] sm:$0xff] }
 0x273   :  { %5199 = vst [vmem:[#allocation37_spill] sm:$0xff] %v4201_v37  ;;  %v5206_v37 = vld [vmem:[#allocation64_spill] sm:$0xff] }
 0x274   :  { %v1048_v31 = vsub.f32 %v1046_v47, %v1047_v56  ;;  %v5186_v47 = vld [vmem:[#allocation32_spill] sm:$0xff] }
 0x275   :  { %v5210_v56 = vld [vmem:[#allocation68_spill] sm:$0xff] }
 0x276   :  { %v1049_v53 = vadd.f32 1e-05, %v1048_v31  ;;  %v4130_v31 = vpop.permute.xlu0 %1806 }
 0x277   :  { %5184 = vst [vmem:[#allocation134_spill] sm:$0xff] %v4130_v31 }
 0x278   :  { %2789 = vrsqrt.f32 %v1049_v53  ;;  %v5190_v53 = vld [vmem:[#allocation40_spill] sm:$0xff] }
 0x27a   :  { %v4182_v31 = vpop.permute.xlu0 %1726 }
 0x27b   :  { %5192 = vst [vmem:[#allocation32_spill] sm:$0xff] %v4182_v31  ;;  %v5212_v31 = vsub.f32 %v5101_v51, %v4080_v28 }
 0x285   :  { %v2790_v24 = vpop.eup %2789 }
 0x286   :  { %v4199_v46 = vrot.slane %v2790_v24, %v5181_v59  ;;  %v5205_v24 = vld [vmem:[#allocation65_spill] sm:$0xff]  ;;  %v5220_v59 = vsub.f32 %v3462_v61, %v4080_v28 }
 0x288   :  { %v4231_v36 = vmul.f32 %v4199_v46, %v5212_v31  ;;  %v4237_v32 = vmul.f32 %v4199_v46, %v5213_v38  ;;  %v4243_v39 = vmul.f32 %v4199_v46, %v5214_v15  ;;  %v4249_v51 = vmul.f32 %v4199_v46, %v5215_v43  ;;  %v4251_v31 = vpop.permute.xlu0 %1801 }
 0x289   :  { %5216 = vst [vmem:[#allocation35_spill] sm:$0xff] %v4251_v31  ;;  %v4257_v38 = vmul.f32 %v4199_v46, %v5217_v17  ;;  %v4263_v15 = vmul.f32 %v4199_v46, %v5218_v52  ;;  %v4269_v43 = vmul.f32 %v4199_v46, %v5219_v50  ;;  %v4275_v57 = vmul.f32 %v4199_v46, %v5220_v59 }
 0x28a   :  { %v5221_v17 = vsub.f32 %v3478_v4, %v4080_v28  ;;  %v5222_v52 = vsub.f32 %v3474_v2, %v4080_v28  ;;  %v5223_v50 = vsub.f32 %v3490_v9, %v4080_v28  ;;  %v5224_v59 = vsub.f32 %v3486_v7, %v4080_v28 }
 0x28b   :  { %v5226_v2 = vsub.f32 %v3502_v14, %v4080_v28  ;;  %v5227_v9 = vsub.f32 %v3500_v13, %v4080_v28  ;;  %v5228_v7 = vsub.f32 %v3516_v20, %v4080_v28  ;;  %v4325_v14 = vmul.f32 %v4199_v46, %v5229_v25 }
 0x28c   :  { %v4281_v55 = vmul.f32 %v4199_v46, %v5221_v17  ;;  %v4287_v62 = vmul.f32 %v4199_v46, %v5222_v52  ;;  %v4293_v61 = vmul.f32 %v4199_v46, %v5223_v50  ;;  %v4299_v4 = vmul.f32 %v4199_v46, %v5224_v59  ;;  %v4301_v17 = vpop.permute.xlu1 %1966 }
 0x28d   :  { %5225 = vst [vmem:[#allocation40_spill] sm:$0xff] %v4301_v17  ;;  %v4307_v52 = vmul.f32 %v4199_v46, %v5226_v2  ;;  %v4313_v50 = vmul.f32 %v4199_v46, %v5227_v9  ;;  %v4319_v59 = vmul.f32 %v4199_v46, %v5228_v7  ;;  %v5230_v2 = vsub.f32 %v5100_v35, %v4080_v28 }
 0x28e   :  { %v5231_v9 = vsub.f32 %v3524_v23, %v4080_v28  ;;  %v5232_v7 = vsub.f32 %v3540_v33, %v4080_v28  ;;  %v5233_v25 = vsub.f32 %v3538_v30, %v4080_v28  ;;  %v5246_v17 = vsub.f32 %v5191_v3, %v4080_v28 }
 0x28f   :  { %v4331_v13 = vmul.f32 %v4199_v46, %v5230_v2  ;;  %v5234_v2 = vsub.f32 %v3554_v48, %v4080_v28  ;;  %v5252_v3 = vsub.f32 %v5107_v26, %v4080_v28  ;;  %v5256_v26 = vsub.f32 %v3679_v5, %v4080_v28 }
 0x290   :  { %v4337_v20 = vmul.f32 %v4199_v46, %v5231_v9  ;;  %v4343_v18 = vmul.f32 %v4199_v46, %v5232_v7  ;;  %v4349_v35 = vmul.f32 %v4199_v46, %v5233_v25  ;;  %v5235_v9 = vsub.f32 %v3550_v42, %v4080_v28 }
 0x291   :  { %v4355_v23 = vmul.f32 %v4199_v46, %v5234_v2  ;;  %v5236_v7 = vsub.f32 %v3566_v60, %v4080_v28  ;;  %v5237_v25 = vsub.f32 %v3562_v54, %v4080_v28  ;;  %v5238_v2 = vsub.f32 %v3578_v10, %v4080_v28 }
 0x292   :  { %v4361_v33 = vmul.f32 %v4199_v46, %v5235_v9  ;;  %v5239_v9 = vsub.f32 %v3576_v6, %v4080_v28  ;;  %v5243_v6 = vsub.f32 %v5187_v45, %v4080_v28  ;;  %v1154_v45 = vmul.f32 %v4199_v46, %v5246_v17  ;;  %v4447_v17 = vpop.permute.xlu1 %1886 }
 0x293   :  { %v4367_v30 = vmul.f32 %v4199_v46, %v5236_v7  ;;  %v4373_v48 = vmul.f32 %v4199_v46, %v5237_v25  ;;  %v4379_v42 = vmul.f32 %v4199_v46, %v5238_v2  ;;  %v5240_v7 = vsub.f32 %v5185_v8, %v4080_v28  ;;  %v4399_v2 = vpop.permute.xlu0 %1721  ;;  %5253 = vst [vmem:[#allocation67_spill] sm:$0xff] %v4447_v17 }
 0x294   :  { %v4385_v60 = vmul.f32 %v4199_v46, %v5239_v9  ;;  %v5241_v25 = vsub.f32 %v5186_v47, %v4080_v28  ;;  %5242 = vst [vmem:[#allocation39_spill] sm:$0xff] %v4399_v2  ;;  %v4405_v9 = vmul.f32 %v4199_v46, %v5243_v6  ;;  %v5244_v8 = vsub.f32 %v5188_v44, %v4080_v28 }
 0x295   :  { %v4391_v54 = vmul.f32 %v4199_v46, %v5240_v7  ;;  %v5245_v47 = vsub.f32 %v5190_v53, %v4080_v28  ;;  %v5247_v6 = vsub.f32 %v3635_v29, %v4080_v28  ;;  %v5249_v44 = vsub.f32 %v3629_v49, %v4080_v28 }
 0x296   :  { %v4397_v10 = vmul.f32 %v4199_v46, %v5241_v25  ;;  %v4411_v7 = vmul.f32 %v4199_v46, %v5244_v8  ;;  %v5251_v53 = vsub.f32 %v3651_v0, %v4080_v28  ;;  %v4445_v29 = vmul.f32 %v4199_v46, %v5252_v3 }
 0x297   :  { %v4417_v25 = vmul.f32 %v4199_v46, %v5245_v47  ;;  %v4427_v2 = vmul.f32 %v4199_v46, %v5247_v6  ;;  %v4433_v8 = vmul.f32 %v4199_v46, %v5249_v44  ;;  %v5254_v49 = vsub.f32 %v3667_v16, %v4080_v28 }
 0x298   :  { %v4439_v47 = vmul.f32 %v4199_v46, %v5251_v53  ;;  %v5255_v0 = vsub.f32 %v5105_v40, %v4080_v28  ;;  %v4465_v53 = vmul.f32 %v4199_v46, %v5256_v26  ;;  %v5257_v3 = vsub.f32 %v3673_v1, %v4080_v28 }
 0x299   :  { %5248 = vst [vmem:[#allocation65_spill] sm:$0xff] %v4427_v2  ;;  %5250 = vst [vmem:[#allocation64_spill] sm:$0xff] %v4433_v8  ;;  %v4453_v6 = vmul.f32 %v4199_v46, %v5254_v49  ;;  %v5258_v49 = vsub.f32 %v5104_v21, %v4080_v28  ;;  %v5260_v26 = vsub.f32 %v3698_v27, %v4080_v28 }
 0x29a   :  { %v4459_v44 = vmul.f32 %v4199_v46, %v5255_v0  ;;  %v4471_v16 = vmul.f32 %v4199_v46, %v5257_v3  ;;  %v5259_v0 = vsub.f32 %v3683_v22, %v4080_v28  ;;  %v5261_v3 = vsub.f32 %v3691_v34, %v4080_v28 }
 0x29b   :  { %v4477_v40 = vmul.f32 %v4199_v46, %v5258_v49  ;;  %v4489_v1 = vmul.f32 %v4199_v46, %v5260_v26  ;;  %v5262_v49 = vsub.f32 %v3711_v11, %v4080_v28  ;;  %v5264_v26 = vsub.f32 %v3724_v63, %v4080_v28 }
 0x29c   :  { %v4483_v5 = vmul.f32 %v4199_v46, %v5259_v0  ;;  %v4495_v21 = vmul.f32 %v4199_v46, %v5261_v3  ;;  %v5263_v0 = vsub.f32 %v3703_v19, %v4080_v28  ;;  %v5265_v3 = vld [vmem:[#allocation53_spill] sm:$0xff] }
 0x29d   :  { %v4501_v22 = vmul.f32 %v4199_v46, %v5262_v49  ;;  %v4513_v34 = vmul.f32 %v4199_v46, %v5264_v26  ;;  %v5266_v2 = vsub.f32 %v5265_v3, %v4080_v28  ;;  %v5268_v49 = vld [vmem:[#allocation55_spill] sm:$0xff]  ;;  %v5274_v26 = vld [vmem:[#allocation57_spill] sm:$0xff] }
 0x29e   :  { %v4507_v27 = vmul.f32 %v4199_v46, %v5263_v0  ;;  %v5269_v8 = vsub.f32 %v5268_v49, %v4080_v28  ;;  %v5271_v0 = vld [vmem:[#allocation54_spill] sm:$0xff]  ;;  %v5275_v31 = vsub.f32 %v5274_v26, %v4080_v28 }
 0x29f   :  { %v4519_v11 = vmul.f32 %v4199_v46, %v5266_v2  ;;  %v5272_v17 = vsub.f32 %v5271_v0, %v4080_v28  ;;  %v5277_v2 = vld [vmem:[#allocation56_spill] sm:$0xff] }
 0x2a0   :  { %v4525_v19 = vmul.f32 %v4199_v46, %v5269_v8  ;;  %v4537_v3 = vmul.f32 %v4199_v46, %v5275_v31  ;;  %v4545_v8 = vpop.permute.xlu0 %1796 }
 0x2a1   :  { %5267 = vst [vmem:[#allocation66_spill] sm:$0xff] %v4519_v11  ;;  %v4531_v63 = vmul.f32 %v4199_v46, %v5272_v17  ;;  %v5278_v11 = vsub.f32 %v5277_v2, %v4080_v28  ;;  %5280 = vst [vmem:[#allocation54_spill] sm:$0xff] %v4545_v8 }
 0x2a2   :  { %5270 = vst [vmem:[#allocation69_spill] sm:$0xff] %v4525_v19  ;;  %5276 = vst [vmem:[#allocation53_spill] sm:$0xff] %v4537_v3  ;;  %v5281_v19 = vld [vmem:[#allocation59_spill] sm:$0xff]  ;;  %v5287_v3 = vld [vmem:[#allocation61_spill] sm:$0xff] }
 0x2a3   :  { %5273 = vst [vmem:[#allocation68_spill] sm:$0xff] %v4531_v63  ;;  %v4543_v49 = vmul.f32 %v4199_v46, %v5278_v11  ;;  %v5282_v0 = vsub.f32 %v5281_v19, %v4080_v28  ;;  %v5284_v63 = vld [vmem:[#allocation58_spill] sm:$0xff]  ;;  %v5288_v2 = vsub.f32 %v5287_v3, %v4080_v28 }
 0x2a4   :  { %v5285_v26 = vsub.f32 %v5284_v63, %v4080_v28 }
 0x2a5   :  { %5279 = vst [vmem:[#allocation55_spill] sm:$0xff] %v4543_v49  ;;  %v4551_v17 = vmul.f32 %v4199_v46, %v5282_v0  ;;  %v4563_v11 = vmul.f32 %v4199_v46, %v5288_v2  ;;  %v5289_v49 = vld [vmem:[#allocation60_spill] sm:$0xff]  ;;  %v5291_v0 = vld [vmem:[#allocation63_spill] sm:$0xff]  ;;  %v5295_v2 = vsub.f32 %v5205_v24, %v4080_v28  ;;  %v5302_v24 = vsub.f32 %v5208_v58, %v4080_v28  ;;  %v5307_v58 = vld [vmem:[#allocation9_spill] sm:$0xff] }
 0x2a6   :  { %v4557_v31 = vmul.f32 %v4199_v46, %v5285_v26  ;;  %v5290_v8 = vsub.f32 %v5289_v49, %v4080_v28  ;;  %v5293_v26 = vld [vmem:[#allocation62_spill] sm:$0xff] }
 0x2a7   :  { %5283 = vst [vmem:[#allocation57_spill] sm:$0xff] %v4551_v17  ;;  %v5292_v17 = vsub.f32 %v5291_v0, %v4080_v28  ;;  %v4587_v49 = vmul.f32 %v4199_v46, %v5295_v2  ;;  %v4607_v2 = vmul.f32 %v4199_v46, %v5302_v24  ;;  %v5309_v24 = vld [vmem:[#allocation8_spill] sm:$0xff] }
 0x2a8   :  { %5286 = vst [vmem:[#allocation56_spill] sm:$0xff] %v4557_v31  ;;  %v4569_v19 = vmul.f32 %v4199_v46, %v5290_v8  ;;  %v5294_v31 = vsub.f32 %v5293_v26, %v4080_v28  ;;  %v5297_v8 = vsub.f32 %v5206_v37, %v4080_v28  ;;  %v5300_v26 = vsub.f32 %v5207_v12, %v4080_v28 }
 0x2a9   :  { %v4575_v63 = vmul.f32 %v4199_v46, %v5292_v17  ;;  %5296 = vst [vmem:[#allocation59_spill] sm:$0xff] %v4587_v49  ;;  %v4595_v17 = vpop.permute.xlu1 %1961  ;;  %v5303_v37 = vsub.f32 %v5209_v41, %v4080_v28  ;;  %v5311_v41 = vld [vmem:[#allocation10_spill] sm:$0xff] }
 0x2aa   :  { %v4581_v3 = vmul.f32 %v4199_v46, %v5294_v31  ;;  %v4593_v0 = vmul.f32 %v4199_v46, %v5297_v8  ;;  %5299 = vst [vmem:[#allocation61_spill] sm:$0xff] %v4595_v17  ;;  %v4601_v31 = vmul.f32 %v4199_v46, %v5300_v26  ;;  %v5304_v17 = vsub.f32 %v5210_v56, %v4080_v28  ;;  %v5305_v26 = vld [vmem:[#allocation6_spill] sm:$0xff]  ;;  %v5312_v28 = vld [vmem:[#allocation11_spill] sm:$0xff] }
 0x2ab   :  { %v4613_v8 = vmul.f32 %v4199_v46, %v5303_v37  ;;  %v4621_v49 = vmul.f32 %v5305_v26, %v4231_v36  ;;  %v4633_v37 = vmul.f32 %v5311_v41, %v4249_v51  ;;  %v4637_v56 = vmul.f32 %v5312_v28, %v4257_v38  ;;  %v5315_v26 = vld [vmem:[#allocation16_spill] sm:$0xff]  ;;  %v5318_v41 = vld [vmem:[#allocation19_spill] sm:$0xff] }
 0x2ac   :  { %5298 = vst [vmem:[#allocation58_spill] sm:$0xff] %v4593_v0  ;;  %5301 = vst [vmem:[#allocation60_spill] sm:$0xff] %v4601_v31  ;;  %v1186_v12 = vmul.f32 %v4199_v46, %v5304_v17  ;;  %v4625_v31 = vmul.f32 %v5307_v58, %v4237_v32  ;;  %v4629_v0 = vmul.f32 %v5309_v24, %v4243_v39  ;;  %v5313_v46 = vld [vmem:[#allocation14_spill] sm:$0xff]  ;;  %v5314_v17 = vld [vmem:[#allocation15_spill] sm:$0xff] }
 0x2ad   :  { %5306 = vst [vmem:[#allocation63_spill] sm:$0xff] %v4621_v49  ;;  %v4641_v36 = vmul.f32 %v5313_v46, %v4263_v15  ;;  %v4645_v32 = vmul.f32 %v5314_v17, %v4269_v43  ;;  %v4649_v39 = vmul.f32 %v5315_v26, %v4275_v57  ;;  %v5316_v58 = vld [vmem:[#allocation17_spill] sm:$0xff]  ;;  %v5317_v24 = vld [vmem:[#allocation18_spill] sm:$0xff]  ;;  %v4661_v15 = vmul.f32 %v5318_v41, %v4293_v61  ;;  %v5319_v28 = vld [vmem:[#allocation20_spill] sm:$0xff]  ;;  %v4667_v46 = vpop.permute.xlu0 %1716 }
 0x2ae   :  { %5308 = vst [vmem:[#allocation62_spill] sm:$0xff] %v4625_v31  ;;  %5310 = vst [vmem:[#allocation6_spill] sm:$0xff] %v4629_v0  ;;  %v4653_v51 = vmul.f32 %v5316_v58, %v4281_v55  ;;  %v4657_v38 = vmul.f32 %v5317_v24, %v4287_v62  ;;  %v4665_v43 = vmul.f32 %v5319_v28, %v4299_v4  ;;  %v5320_v57 = vld [vmem:[#allocation21_spill] sm:$0xff]  ;;  %v5321_v55 = vld [vmem:[#allocation22_spill] sm:$0xff] }
 0x2af   :  { %v1583_v17 = vmul.f32 %v5320_v57, %v4307_v52  ;;  %v1584_v26 = vmul.f32 %v5321_v55, %v4313_v50  ;;  %v5322_v58 = vld [vmem:[#allocation23_spill] sm:$0xff]  ;;  %v5323_v24 = vld [vmem:[#allocation24_spill] sm:$0xff]  ;;  %v5324_v61 = vld [vmem:[#allocation26_spill] sm:$0xff] }
 0x2b0   :  { %v1585_v62 = vmul.f32 %v5322_v58, %v4319_v59  ;;  %v1586_v49 = vmul.f32 %v5323_v24, %v4325_v14  ;;  %v4679_v41 = vmul.f32 %v5324_v61, %v4331_v13  ;;  %v5326_v4 = vld [vmem:[#allocation27_spill] sm:$0xff]  ;;  %v5328_v31 = vld [vmem:[#allocation28_spill] sm:$0xff]  ;;  %v5329_v50 = vld [vmem:[#allocation29_spill] sm:$0xff]  ;;  %v4693_v59 = vpop.permute.xlu1 %1881 }
 0x2b1   :  { %v4683_v28 = vmul.f32 %v5326_v4, %v4337_v20  ;;  %v4687_v52 = vmul.f32 %v5328_v31, %v4343_v18  ;;  %v4691_v57 = vmul.f32 %v5329_v50, %v4349_v35  ;;  %5330 = vst [vmem:[#allocation10_spill] sm:$0xff] %v4693_v59  ;;  %v5331_v14 = vld [vmem:[#allocation30_spill] sm:$0xff]  ;;  %v5332_v13 = vld [vmem:[#allocation31_spill] sm:$0xff]  ;;  %v5333_v20 = vld [vmem:[#allocation33_spill] sm:$0xff] }
 0x2b2   :  { %5325 = vst [vmem:[#allocation9_spill] sm:$0xff] %v4679_v41  ;;  %v4697_v55 = vmul.f32 %v5331_v14, %v4355_v23  ;;  %v4701_v58 = vmul.f32 %v5332_v13, %v4361_v33  ;;  %v4705_v24 = vmul.f32 %v5333_v20, %v4367_v30  ;;  %v5334_v18 = vld [vmem:[#allocation12_spill] sm:$0xff]  ;;  %v5336_v4 = vld [vmem:[#allocation38_spill] sm:$0xff]  ;;  %v5337_v23 = vld [vmem:[#allocation41_spill] sm:$0xff] }
 0x2b3   :  { %5327 = vst [vmem:[#allocation8_spill] sm:$0xff] %v4683_v28  ;;  %v1602_v31 = vmul.f32 %v5334_v18, %v1154_v45  ;;  %v5335_v61 = vld [vmem:[#allocation36_spill] sm:$0xff]  ;;  %v4714_v50 = vmul.f32 %v5336_v4, %v4379_v42  ;;  %v4718_v14 = vmul.f32 %v5337_v23, %v4385_v60  ;;  %v5338_v33 = vld [vmem:[#allocation42_spill] sm:$0xff]  ;;  %v5340_v45 = vld [vmem:[#allocation45_spill] sm:$0xff] }
 0x2b4   :  { %v4710_v35 = vmul.f32 %v5335_v61, %v4373_v48  ;;  %v1597_v13 = vmul.f32 %v5338_v33, %v4391_v54  ;;  %v5339_v30 = vld [vmem:[#allocation44_spill] sm:$0xff]  ;;  %v1599_v18 = vmul.f32 %v5340_v45, %v4405_v9  ;;  %v5341_v48 = vld [vmem:[#allocation47_spill] sm:$0xff]  ;;  %v5347_v54 = vld [vmem:[#allocation49_spill] sm:$0xff] }
 0x2b5   :  { %v1598_v20 = vmul.f32 %v5339_v30, %v4397_v10  ;;  %v1600_v61 = vmul.f32 %v5341_v48, %v4411_v7  ;;  %v5342_v59 = vld [vmem:[#allocation48_spill] sm:$0xff]  ;;  %v5343_v4 = vld [vmem:[#allocation51_spill] sm:$0xff]  ;;  %v4740_v10 = vmul.f32 %v5347_v54, %v4453_v6  ;;  %v4743_v30 = vpop.permute.xlu0 %1791  ;;  %v5350_v7 = vld [vmem:[#allocation46_spill] sm:$0xff] }
 0x2b6   :  { %v1601_v42 = vmul.f32 %v5342_v59, %v4417_v25  ;;  %v4732_v41 = vmul.f32 %v5343_v4, %v4439_v47  ;;  %v5345_v60 = vld [vmem:[#allocation52_spill] sm:$0xff]  ;;  %v5349_v33 = vld [vmem:[#allocation87_spill] sm:$0xff]  ;;  %v4747_v45 = vmul.f32 %v5350_v7, %v4459_v44  ;;  %v5354_v59 = vld [vmem:[#allocation70_spill] sm:$0xff] }
 0x2b7   :  { %v4736_v23 = vmul.f32 %v5345_v60, %v4445_v29  ;;  %5348 = vst [vmem:[#allocation15_spill] sm:$0xff] %v4740_v10  ;;  %v2034_v9 = vadd.f32 %v5349_v33, %v1586_v49  ;;  %v5352_v25 = vld [vmem:[#allocation43_spill] sm:$0xff]  ;;  %v4755_v29 = vmul.f32 %v5354_v59, %v4471_v16  ;;  %v5355_v48 = vld [vmem:[#allocation86_spill] sm:$0xff]  ;;  %v5357_v49 = vld [vmem:[#allocation72_spill] sm:$0xff]  ;;  %v4774_v16 = vpop.permute.xlu1 %1956 }
 0x2b8   :  { %5344 = vst [vmem:[#allocation11_spill] sm:$0xff] %v4732_v41  ;;  %5351 = vst [vmem:[#allocation16_spill] sm:$0xff] %v4747_v45  ;;  %v4751_v47 = vmul.f32 %v5352_v25, %v4465_v53  ;;  %v2050_v4 = vadd.f32 %v5355_v48, %v1602_v31  ;;  %v5356_v6 = vld [vmem:[#allocation71_spill] sm:$0xff]  ;;  %v4764_v54 = vmul.f32 %v5357_v49, %v4483_v5  ;;  %v5358_v44 = vld [vmem:[#allocation73_spill] sm:$0xff] }
 0x2b9   :  { %5346 = vst [vmem:[#allocation14_spill] sm:$0xff] %v4736_v23  ;;  %v4760_v60 = vmul.f32 %v5356_v6, %v4477_v40  ;;  %v4768_v33 = vmul.f32 %v5358_v44, %v4489_v1  ;;  %v5359_v53 = vld [vmem:[#allocation74_spill] sm:$0xff]  ;;  %5360 = vst [vmem:[#allocation18_spill] sm:$0xff] %v4774_v16  ;;  %v5361_v31 = vld [vmem:[#allocation75_spill] sm:$0xff]  ;;  %v2098_v45 = vmax.f32 %v2034_v9, 0.0 }
 0x2ba   :  { %5353 = vst [vmem:[#allocation17_spill] sm:$0xff] %v4751_v47  ;;  %v4772_v7 = vmul.f32 %v5359_v53, %v4495_v21  ;;  %v4778_v25 = vmul.f32 %v5361_v31, %v4501_v22  ;;  %v5362_v40 = vld [vmem:[#allocation76_spill] sm:$0xff]  ;;  %v5363_v5 = vld [vmem:[#allocation77_spill] sm:$0xff]  ;;  %v5365_v1 = vld [vmem:[#allocation66_spill] sm:$0xff] }
 0x2bb   :  { %v1616_v59 = vmul.f32 %v5362_v40, %v4507_v27  ;;  %v1617_v48 = vmul.f32 %v5363_v5, %v4513_v34  ;;  %v5364_v6 = vld [vmem:[#allocation89_spill] sm:$0xff]  ;;  %v5366_v44 = vld [vmem:[#allocation78_spill] sm:$0xff]  ;;  %v5370_v16 = vld [vmem:[#allocation91_spill] sm:$0xff]  ;;  %v2114_v5 = vmax.f32 %v2050_v4, 0.0 }
 0x2bc   :  { %v2049_v49 = vadd.f32 %v5364_v6, %v1601_v42  ;;  %v1618_v41 = vmul.f32 %v5366_v44, %v5365_v1  ;;  %v5367_v23 = vld [vmem:[#allocation53_spill] sm:$0xff]  ;;  %v2033_v10 = vadd.f32 %v5370_v16, %v1585_v62  ;;  %v5371_v22 = vld [vmem:[#allocation55_spill] sm:$0xff]  ;;  %v5372_v31 = vld [vmem:[#allocation82_spill] sm:$0xff] }
 0x2bd   :  { %v5368_v21 = vld [vmem:[#allocation81_spill] sm:$0xff]  ;;  %v4794_v28 = vmul.f32 %v5372_v31, %v5371_v22  ;;  %v5374_v47 = vld [vmem:[#allocation94_spill] sm:$0xff]  ;;  %v5376_v6 = vld [vmem:[#allocation83_spill] sm:$0xff]  ;;  %v4811_v22 = vpop.permute.xlu0 %1711  ;;  %2609 = vmatprep.subr.mxu0 %v2114_v5 }
 0x2be   :  { %v4789_v53 = vmul.f32 %v5368_v21, %v5367_v23  ;;  %v5373_v27 = vld [vmem:[#allocation85_spill] sm:$0xff]  ;;  %v2048_v34 = vadd.f32 %v5374_v47, %v1600_v61  ;;  %v5377_v1 = vld [vmem:[#allocation56_spill] sm:$0xff]  ;;  %v5383_v31 = vld [vmem:[#allocation99_spill] sm:$0xff]  ;;  %2610 = vmatpush3.msra.mxu0 %v2098_v45 }
 0x2bf   :  { %v1634_v40 = vmul.f32 %v5373_v27, %v1186_v12  ;;  %v5375_v42 = vld [vmem:[#allocation57_spill] sm:$0xff]  ;;  %v5378_v44 = vld [vmem:[#allocation84_spill] sm:$0xff]  ;;  %v2047_v27 = vadd.f32 %v5383_v31, %v1599_v18  ;;  %v5390_v18 = vld [vmem:[#allocation90_spill] sm:$0xff] }
 0x2c0   :  { %5369 = vst [vmem:[#allocation19_spill] sm:$0xff] %v4789_v53  ;;  %v4800_v0 = vmul.f32 %v5376_v6, %v5375_v42  ;;  %v4804_v23 = vmul.f32 %v5378_v44, %v5377_v1  ;;  %v5379_v62 = vld [vmem:[#allocation129_spill] sm:$0xff]  ;;  %v5380_v16 = vld [vmem:[#allocation96_spill] sm:$0xff]  ;;  %v2113_v42 = vmax.f32 %v2049_v49, 0.0  ;;  %v5384_v6 = vld [vmem:[#allocation119_spill] sm:$0xff]  ;;  %v4826_v53 = vpop.permute.xlu1 %1876  ;;  %v2112_v5 = vmax.f32 %v2048_v34, 0.0 }
 0x2c1   :  { %v4808_v9 = vmul.f32 %v5379_v62, %v4563_v11  ;;  %v2032_v21 = vadd.f32 %v5380_v16, %v1584_v26  ;;  %v5381_v12 = vld [vmem:[#allocation124_spill] sm:$0xff]  ;;  %v4822_v1 = vmul.f32 %v5384_v6, %v4575_v63  ;;  %v5385_v11 = vld [vmem:[#allocation101_spill] sm:$0xff]  ;;  %v2097_v16 = vmax.f32 %v2033_v10, 0.0  ;;  %5387 = vst [vmem:[#allocation20_spill] sm:$0xff] %v4826_v53  ;;  %v5393_v6 = vld [vmem:[#allocation103_spill] sm:$0xff] }
 0x2c2   :  { %v4815_v61 = vmul.f32 %v5381_v12, %v4569_v19  ;;  %v5382_v47 = vld [vmem:[#allocation88_spill] sm:$0xff]  ;;  %v2031_v44 = vadd.f32 %v5385_v11, %v1583_v17  ;;  %v5388_v19 = vld [vmem:[#allocation93_spill] sm:$0xff]  ;;  %v2082_v49 = vadd.f32 %v5390_v18, %v1634_v40  ;;  %2611 = vmatprep.subr.mxu0 %v2113_v42  ;;  %v5392_v17 = vld [vmem:[#allocation58_spill] sm:$0xff]  ;;  %v2111_v42 = vmax.f32 %v2047_v27, 0.0 }
 0x2c3   :  { %v1633_v4 = vmul.f32 %v5382_v47, %v4613_v8  ;;  %v5386_v26 = vld [vmem:[#allocation92_spill] sm:$0xff]  ;;  %v1632_v12 = vmul.f32 %v5388_v19, %v4607_v2  ;;  %v5391_v63 = vld [vmem:[#allocation113_spill] sm:$0xff]  ;;  %v5394_v10 = vld [vmem:[#allocation106_spill] sm:$0xff]  ;;  %v2096_v11 = vmax.f32 %v2032_v21, 0.0  ;;  %2612 = vmatpush3.msra.mxu0 %v2097_v16 }
 0x2c4   :  { %v2066_v62 = vadd.f32 %v5386_v26, %v1618_v41  ;;  %v5389_v8 = vld [vmem:[#allocation104_spill] sm:$0xff]  ;;  %v4834_v31 = vmul.f32 %v5391_v63, %v4581_v3  ;;  %v1630_v41 = vmul.f32 %v5393_v6, %v5392_v17  ;;  %v2030_v45 = vadd.f32 %v5394_v10, %v4665_v43  ;;  %v5396_v2 = vld [vmem:[#allocation98_spill] sm:$0xff]  ;;  %v5398_v40 = vld [vmem:[#allocation95_spill] sm:$0xff]  ;;  %2613 = vmatprep.subr.mxu0 %v2112_v5  ;;  %v4847_v43 = vpop.permute.xlu0 %1786 }
 0x2c5   :  { %v2046_v47 = vadd.f32 %v5389_v8, %v1598_v20  ;;  %v5395_v26 = vld [vmem:[#allocation60_spill] sm:$0xff]  ;;  %v5397_v20 = vld [vmem:[#allocation109_spill] sm:$0xff]  ;;  %v2081_v34 = vadd.f32 %v5398_v40, %v1633_v4  ;;  %v5399_v3 = vld [vmem:[#allocation111_spill] sm:$0xff]  ;;  %v2095_v17 = vmax.f32 %v2031_v44, 0.0  ;;  %2614 = vmatpush3.msra.mxu0 %v2096_v11  ;;  %v4857_v11 = vpop.permute.xlu1 %1951 }
 0x2c6   :  { %v1631_v19 = vmul.f32 %v5396_v2, %v5395_v26  ;;  %v2045_v8 = vadd.f32 %v5397_v20, %v1597_v13  ;;  %v2029_v18 = vadd.f32 %v5399_v3, %v4661_v15  ;;  %v5400_v63 = vld [vmem:[#allocation97_spill] sm:$0xff]  ;;  %v2130_v6 = vmax.f32 %v2066_v62, 0.0  ;;  %v5401_v21 = vld [vmem:[#allocation114_spill] sm:$0xff]  ;;  %v5402_v10 = vld [vmem:[#allocation100_spill] sm:$0xff]  ;;  %2615 = vmatprep.subr.mxu0 %v2111_v42 }
 0x2c7   :  { %v2065_v53 = vadd.f32 %v5400_v63, %v1617_v48  ;;  %v2044_v16 = vadd.f32 %v5401_v21, %v4718_v14  ;;  %v2080_v26 = vadd.f32 %v5402_v10, %v1632_v12  ;;  %v2110_v13 = vmax.f32 %v2046_v47, 0.0  ;;  %v5403_v4 = vld [vmem:[#allocation59_spill] sm:$0xff]  ;;  %v5404_v27 = vld [vmem:[#allocation108_spill] sm:$0xff]  ;;  %v5406_v48 = vld [vmem:[#allocation102_spill] sm:$0xff]  ;;  %2616 = vmatpush3.msra.mxu0 %v2095_v17 }
 0x2c8   :  { %v2146_v2 = vmax.f32 %v2082_v49, 0.0  ;;  %v1629_v5 = vmul.f32 %v5404_v27, %v5403_v4  ;;  %v5405_v15 = vld [vmem:[#allocation116_spill] sm:$0xff]  ;;  %v2064_v44 = vadd.f32 %v5406_v48, %v1616_v59  ;;  %v2094_v62 = vmax.f32 %v2030_v45, 0.0  ;;  %v5408_v3 = vld [vmem:[#allocation105_spill] sm:$0xff]  ;;  %v5409_v42 = vld [vmem:[#allocation122_spill] sm:$0xff] }
 0x2c9   :  { %v2028_v20 = vadd.f32 %v5405_v15, %v4657_v38  ;;  %v5407_v40 = vld [vmem:[#allocation120_spill] sm:$0xff]  ;;  %v2079_v12 = vadd.f32 %v5408_v3, %v1631_v19  ;;  %v2109_v47 = vmax.f32 %v2045_v8, 0.0  ;;  %v2145_v49 = vmax.f32 %v2081_v34, 0.0  ;;  %2617 = vmatprep.subr.mxu0 %v2110_v13  ;;  %v5410_v38 = vld [vmem:[#allocation107_spill] sm:$0xff]  ;;  %v5411_v17 = vld [vmem:[#allocation125_spill] sm:$0xff] }
 0x2ca   :  { %v2043_v14 = vadd.f32 %v5407_v40, %v4714_v50  ;;  %2644 = vmatprep.subr.mxu1 %v2146_v2  ;;  %v2027_v63 = vadd.f32 %v5409_v42, %v4653_v51  ;;  %v2063_v21 = vadd.f32 %v5410_v38, %v4778_v25  ;;  %v2093_v59 = vmax.f32 %v2029_v18, 0.0  ;;  %2618 = vmatpush3.msra.mxu0 %v2094_v62  ;;  %v5412_v50 = vld [vmem:[#allocation110_spill] sm:$0xff]  ;;  %v5413_v34 = vld [vmem:[#allocation127_spill] sm:$0xff]  ;;  %v5414_v51 = vld [vmem:[#allocation112_spill] sm:$0xff]  ;;  %v4882_v62 = vpop.permute.xlu1 %1871 }
 0x2cb   :  { %v2129_v45 = vmax.f32 %v2065_v53, 0.0  ;;  %2645 = vmatpush3.msra.mxu1 %v2130_v6  ;;  %v2042_v10 = vadd.f32 %v5411_v17, %v4710_v35  ;;  %v2078_v4 = vadd.f32 %v5412_v50, %v1630_v41  ;;  %v2108_v19 = vmax.f32 %v2044_v16, 0.0  ;;  %2619 = vmatprep.subr.mxu0 %v2109_v47  ;;  %v4873_v53 = vpop.permute.xlu0 %1706  ;;  %v5415_v35 = vld [vmem:[#allocation130_spill] sm:$0xff]  ;;  %v5416_v41 = vld [vmem:[#allocation115_spill] sm:$0xff] }
 0x2cc   :  { %v2144_v8 = vmax.f32 %v2080_v26, 0.0  ;;  %2646 = vmatprep.subr.mxu1 %v2145_v49  ;;  %v2026_v13 = vadd.f32 %v5413_v34, %v4649_v39  ;;  %v2062_v2 = vadd.f32 %v5414_v51, %v4772_v7  ;;  %v2092_v25 = vmax.f32 %v2028_v20, 0.0  ;;  %2620 = vmatpush3.msra.mxu0 %v2093_v59  ;;  %v5417_v39 = vld [vmem:[#allocation132_spill] sm:$0xff]  ;;  %v5418_v7 = vld [vmem:[#allocation118_spill] sm:$0xff]  ;;  %v5423_v38 = vld [vmem:[#allocation35_spill] sm:$0xff] }
 0x2cd   :  { %v2128_v18 = vmax.f32 %v2064_v44, 0.0  ;;  %2647 = vmatpush3.msra.mxu1 %v2129_v45  ;;  %v2041_v6 = vadd.f32 %v5415_v35, %v4705_v24  ;;  %v2077_v16 = vadd.f32 %v5416_v41, %v1629_v5  ;;  %v2107_v26 = vmax.f32 %v2043_v14, 0.0  ;;  %2621 = vmatprep.subr.mxu0 %v2108_v19  ;;  %v5419_v24 = vld [vmem:[#allocation134_spill] sm:$0xff]  ;;  %v5420_v5 = vld [vmem:[#allocation121_spill] sm:$0xff]  ;;  %v5425_v17 = vld [vmem:[#allocation39_spill] sm:$0xff] }
 0x2ce   :  { %v2143_v27 = vmax.f32 %v2079_v12, 0.0  ;;  %2648 = vmatprep.subr.mxu1 %v2144_v8  ;;  %v2025_v15 = vadd.f32 %v5417_v39, %v4645_v32  ;;  %v2061_v20 = vadd.f32 %v5418_v7, %v4768_v33  ;;  %v2091_v48 = vmax.f32 %v2027_v63, 0.0  ;;  %2622 = vmatpush3.msra.mxu0 %v2092_v25  ;;  %v5421_v32 = vld [vmem:[#allocation32_spill] sm:$0xff]  ;;  %v5422_v33 = vld [vmem:[#allocation123_spill] sm:$0xff]  ;;  %v4908_v35 = vpop.permute.xlu1 %1946 }
 0x2cf   :  { %v2127_v44 = vmax.f32 %v2063_v21, 0.0  ;;  %2649 = vmatpush3.msra.mxu1 %v2128_v18  ;;  %v2040_v40 = vadd.f32 %v5419_v24, %v4701_v58  ;;  %v2076_v14 = vadd.f32 %v5420_v5, %v4834_v31  ;;  %v2106_v3 = vmax.f32 %v2042_v10, 0.0  ;;  %2623 = vmatprep.subr.mxu0 %v2107_v26  ;;  %v5424_v21 = vld [vmem:[#allocation126_spill] sm:$0xff]  ;;  %v5426_v10 = vld [vmem:[#allocation128_spill] sm:$0xff]  ;;  %v1782_v19 = vpop.permute.xlu0 %1781  ;;  %v5433_v26 = vld [vmem:[#allocation37_spill] sm:$0xff] }
 0x2d0   :  { %v2142_v12 = vmax.f32 %v2078_v4, 0.0  ;;  %2650 = vmatprep.subr.mxu1 %v2143_v27  ;;  %v2024_v47 = vadd.f32 %v5421_v32, %v4641_v36  ;;  %v2060_v49 = vadd.f32 %v5422_v33, %v4764_v54  ;;  %v2090_v42 = vmax.f32 %v2026_v13, 0.0  ;;  %2624 = vmatpush3.msra.mxu0 %v2091_v48  ;;  %v5434_v7 = vld [vmem:[#allocation8_spill] sm:$0xff]  ;;  %v5439_v32 = vld [vmem:[#allocation9_spill] sm:$0xff] }
 0x2d1   :  { %v2126_v63 = vmax.f32 %v2062_v2, 0.0  ;;  %2651 = vmatpush3.msra.mxu1 %v2127_v44  ;;  %v2039_v58 = vadd.f32 %v5423_v38, %v4697_v55  ;;  %v2075_v31 = vadd.f32 %v5424_v21, %v4822_v1  ;;  %v2105_v59 = vmax.f32 %v2041_v6, 0.0  ;;  %2625 = vmatprep.subr.mxu0 %v2106_v3  ;;  %v5427_v55 = vld [vmem:[#allocation54_spill] sm:$0xff]  ;;  %v5428_v1 = vld [vmem:[#allocation131_spill] sm:$0xff]  ;;  %v5437_v24 = vld [vmem:[#allocation16_spill] sm:$0xff] }
 0x2d2   :  { %v2141_v45 = vmax.f32 %v2077_v16, 0.0  ;;  %2652 = vmatprep.subr.mxu1 %v2142_v12  ;;  %v2023_v36 = vadd.f32 %v5425_v17, %v4637_v56  ;;  %v2059_v54 = vadd.f32 %v5426_v10, %v4760_v60  ;;  %v2089_v50 = vmax.f32 %v2025_v15, 0.0  ;;  %2626 = vmatpush3.msra.mxu0 %v2090_v42  ;;  %v5429_v60 = vld [vmem:[#allocation133_spill] sm:$0xff]  ;;  %v5436_v44 = vld [vmem:[#allocation62_spill] sm:$0xff]  ;;  %v5441_v42 = vld [vmem:[#allocation63_spill] sm:$0xff] }
 0x2d3   :  { %v2125_v4 = vmax.f32 %v2061_v20, 0.0  ;;  %2653 = vmatpush3.msra.mxu1 %v2126_v63  ;;  %v2038_v8 = vadd.f32 %v5427_v55, %v4691_v57  ;;  %v2074_v34 = vadd.f32 %v5428_v1, %v4815_v61  ;;  %v2104_v13 = vmax.f32 %v2040_v40, 0.0  ;;  %2627 = vmatprep.subr.mxu0 %v2105_v59  ;;  %v5430_v61 = vld [vmem:[#allocation34_spill] sm:$0xff]  ;;  %v5438_v40 = vld [vmem:[#allocation67_spill] sm:$0xff]  ;;  %v1702_v12 = vpop.permute.xlu0 %1701  ;;  %v1867_v59 = vpop.permute.xlu1 %1866  ;;  %v5445_v17 = vld [vmem:[#allocation80_spill] sm:$0xff] }
 0x2d4   :  { %v2140_v51 = vmax.f32 %v2076_v14, 0.0  ;;  %2654 = vmatprep.subr.mxu1 %v2141_v45  ;;  %v2022_v56 = vadd.f32 %v4667_v46, %v4633_v37  ;;  %v2058_v2 = vadd.f32 %v5429_v60, %v4755_v29  ;;  %v2088_v25 = vmax.f32 %v2024_v47, 0.0  ;;  %2628 = vmatpush3.msra.mxu0 %v2089_v50  ;;  %v5431_v37 = vld [vmem:[#allocation6_spill] sm:$0xff]  ;;  %v5432_v29 = vld [vmem:[#allocation17_spill] sm:$0xff]  ;;  %v5444_v45 = vld [vmem:[#allocation68_spill] sm:$0xff] }
 0x2d5   :  { %v2124_v18 = vmax.f32 %v2060_v49, 0.0  ;;  %2655 = vmatpush3.msra.mxu1 %v2125_v4  ;;  %v2037_v57 = vadd.f32 %v4743_v30, %v4687_v52  ;;  %v2073_v6 = vadd.f32 %v5430_v61, %v4808_v9  ;;  %v2103_v41 = vmax.f32 %v2039_v58, 0.0  ;;  %2629 = vmatprep.subr.mxu0 %v2104_v13  ;;  %v5435_v30 = vld [vmem:[#allocation40_spill] sm:$0xff]  ;;  %v5440_v47 = vld [vmem:[#allocation61_spill] sm:$0xff]  ;;  %v5443_v38 = vld [vmem:[#allocation10_spill] sm:$0xff] }
 0x2d6   :  { %v2139_v16 = vmax.f32 %v2075_v31, 0.0  ;;  %2656 = vmatprep.subr.mxu1 %v2140_v51  ;;  %v2021_v46 = vadd.f32 %v4811_v22, %v5431_v37  ;;  %v2057_v27 = vadd.f32 %v5433_v26, %v5432_v29  ;;  %v2087_v39 = vmax.f32 %v2023_v36, 0.0  ;;  %2630 = vmatpush3.msra.mxu0 %v2088_v25  ;;  %v5446_v10 = vld [vmem:[#allocation18_spill] sm:$0xff]  ;;  %v5447_v4 = vld [vmem:[#allocation64_spill] sm:$0xff]  ;;  %v5452_v60 = vld [vmem:[#allocation79_spill] sm:$0xff] }
 0x2d7   :  { %v2123_v15 = vmax.f32 %v2059_v54, 0.0  ;;  %2657 = vmatpush3.msra.mxu1 %v2124_v18  ;;  %v2036_v52 = vadd.f32 %v4847_v43, %v5434_v7  ;;  %v2072_v9 = vadd.f32 %v5435_v30, %v4804_v23  ;;  %v2102_v20 = vmax.f32 %v2038_v8, 0.0  ;;  %2631 = vmatprep.subr.mxu0 %v2103_v41  ;;  %v5449_v8 = vld [vmem:[#allocation14_spill] sm:$0xff]  ;;  %v5450_v1 = vld [vmem:[#allocation20_spill] sm:$0xff]  ;;  %v5453_v25 = vld [vmem:[#allocation19_spill] sm:$0xff]  ;;  %v1862_v7 = vpop.permute.xlu1 %1861 }
 0x2d8   :  { %v2138_v48 = vmax.f32 %v2074_v34, 0.0  ;;  %2658 = vmatprep.subr.mxu1 %v2139_v16  ;;  %v2020_v22 = vadd.f32 %v4873_v53, %v5436_v44  ;;  %v2056_v5 = vadd.f32 %v5438_v40, %v5437_v24  ;;  %v2086_v14 = vmax.f32 %v2022_v56, 0.0  ;;  %2632 = vmatpush3.msra.mxu0 %v2087_v39  ;;  %v5442_v53 = vld [vmem:[#allocation15_spill] sm:$0xff]  ;;  %v5451_v56 = vld [vmem:[#allocation69_spill] sm:$0xff] }
 0x2d9   :  { %v2122_v3 = vmax.f32 %v2058_v2, 0.0  ;;  %2659 = vmatpush3.msra.mxu1 %v2123_v15  ;;  %v2035_v43 = vadd.f32 %v1782_v19, %v5439_v32  ;;  %v2071_v23 = vadd.f32 %v5440_v47, %v4800_v0  ;;  %v2101_v33 = vmax.f32 %v2037_v57, 0.0  ;;  %2633 = vmatprep.subr.mxu0 %v2102_v20  ;;  %v5448_v19 = vld [vmem:[#allocation13_spill] sm:$0xff]  ;;  %v5456_v16 = vld [vmem:[#allocation11_spill] sm:$0xff] }
 0x2da   :  { %v2137_v49 = vmax.f32 %v2073_v6, 0.0  ;;  %2660 = vmatprep.subr.mxu1 %v2138_v48  ;;  %v2019_v63 = vadd.f32 %v1702_v12, %v5441_v42  ;;  %v2055_v58 = vadd.f32 %v5443_v38, %v5442_v53  ;;  %v2085_v21 = vmax.f32 %v2021_v46, 0.0  ;;  %2634 = vmatpush3.msra.mxu0 %v2086_v14  ;;  %v5454_v61 = vld [vmem:[#allocation65_spill] sm:$0xff]  ;;  %v5460_v40 = vld [vmem:[#allocation7_spill] sm:$0xff] }
 0x2db   :  { %v2121_v31 = vmax.f32 %v2057_v27, 0.0  ;;  %2661 = vmatpush3.msra.mxu1 %v2122_v3  ;;  %v1620_v36 = vmul.f32 %v5445_v17, %v5444_v45  ;;  %v2070_v0 = vadd.f32 %v5446_v10, %v4794_v28  ;;  %v2100_v54 = vmax.f32 %v2036_v52, 0.0  ;;  %2635 = vmatprep.subr.mxu0 %v2101_v33  ;;  %v5455_v6 = vld [vmem:[#allocation25_spill] sm:$0xff] }
 0x2dc   :  { %v2136_v50 = vmax.f32 %v2072_v9, 0.0  ;;  %2662 = vmatprep.subr.mxu1 %v2137_v49  ;;  %v1604_v55 = vmul.f32 %v5448_v19, %v5447_v4  ;;  %v2054_v34 = vadd.f32 %v5450_v1, %v5449_v8  ;;  %v2084_v13 = vmax.f32 %v2020_v22, 0.0  ;;  %2636 = vmatpush3.msra.mxu0 %v2085_v21  ;;  %v5457_v9 = vld [vmem:[#allocation117_spill] sm:$0xff] }
 0x2dd   :  { %v2120_v51 = vmax.f32 %v2056_v5, 0.0  ;;  %2663 = vmatpush3.msra.mxu1 %v2121_v31  ;;  %v1619_v2 = vmul.f32 %v5452_v60, %v5451_v56  ;;  %v2069_v28 = vadd.f32 %v4857_v11, %v5453_v25  ;;  %v2099_v18 = vmax.f32 %v2035_v43, 0.0  ;;  %2637 = vmatprep.subr.mxu0 %v2100_v54  ;;  %v1942_v11 = vpop.permute.xlu0 %1941 }
 0x2de   :  { %v2135_v57 = vmax.f32 %v2071_v23, 0.0  ;;  %2664 = vmatprep.subr.mxu1 %v2136_v50  ;;  %v1603_v41 = vmul.f32 %v5455_v6, %v5454_v61  ;;  %v2053_v37 = vadd.f32 %v4882_v62, %v5456_v16  ;;  %v2083_v46 = vmax.f32 %v2019_v63, 0.0  ;;  %2638 = vmatpush3.msra.mxu0 %v2084_v13  ;;  %v5458_v62 = vld [vmem:[#allocation50_spill] sm:$0xff] }
 0x2df   :  { %v2119_v29 = vmax.f32 %v2055_v58, 0.0  ;;  %2665 = vmatpush3.msra.mxu1 %v2120_v51  ;;  %v2068_v26 = vadd.f32 %v4908_v35, %v1620_v36  ;;  %v2134_v27 = vmax.f32 %v2070_v0, 0.0  ;;  %2639 = vmatprep.subr.mxu0 %v2099_v18  ;;  %v2052_v39 = vadd.f32 %v1867_v59, %v1604_v55 }
 0x2e0   :  { %2666 = vmatprep.subr.mxu1 %v2135_v57  ;;  %v2118_v15 = vmax.f32 %v2054_v34, 0.0  ;;  %2640 = vmatpush3.msra.mxu0 %v2083_v46  ;;  %v2067_v52 = vadd.f32 %v1942_v11, %v1619_v2  ;;  %v2133_v30 = vmax.f32 %v2069_v28, 0.0  ;;  %v5459_v20 = vrot.slane %v5457_v9, %v5458_v62 }
 0x2e1   :  { %2667 = vmatpush3.msra.mxu1 %v2119_v29  ;;  %v2051_v48 = vadd.f32 %v1862_v7, %v1603_v41  ;;  %v2117_v44 = vmax.f32 %v2053_v37, 0.0  ;;  %v2132_v35 = vmax.f32 %v2068_v26, 0.0  ;;  %v2116_v22 = vmax.f32 %v2052_v39, 0.0  ;;  %v2151_v43 = vpop.permute.xlu0 %2150 }
 0x2e2   :  { %2668 = vmatprep.subr.mxu1 %v2134_v27  ;;  %2243 = vmatmul.mubr.f32.vlgmr.msra.gmra.mxu0 %v5459_v20  ;;  %v2131_v24 = vmax.f32 %v2067_v52, 0.0  ;;  %v5461_v5 = vsub.s32 2, %v5460_v40  ;;  %v2156_v23 = vrot.slane %v2151_v43, %v5458_v62 }
 0x2e3   :  { %2669 = vmatpush3.msra.mxu1 %v2118_v15  ;;  %v2115_v3 = vmax.f32 %v2051_v48, 0.0 }
 0x2e4   :  { %2670 = vmatprep.subr.mxu1 %v2133_v30  ;;  %v2169_v14 = vrot.slane %v5457_v9, %v5461_v5 }
 0x2e5   :  { %2671 = vmatpush3.msra.mxu1 %v2117_v44 }
 0x2e6   :  { %2672 = vmatprep.subr.mxu1 %v2132_v35 }
 0x2e7   :  { %2673 = vmatpush3.msra.mxu1 %v2116_v22 }
 0x2e8   :  { %2674 = vmatprep.subr.mxu1 %v2131_v24 }
 0x2e9   :  { %2675 = vmatpush3.msra.mxu1 %v2115_v3 }
 0x2ea   :  { %2313 = vmatmul.mubr.f32.vlgmr.msra.gmra.mxu1 %v2169_v14 }
 0x3a2   :  { %v2641_v12 = vpop.f32.mrf.mxu0 }
 0x3a4   :  { %v2642_v32 = vpop.f32.mrf.mxu0 }
 0x3a5   :  { %v2643_v47 = vadd.f32 %v2642_v32, %v2641_v12 }
 0x3a7   :  { %v2245_v49 = vadd.f32 %v2643_v47, %v2156_v23 }
 0x3aa   :  { %v2676_v33 = vpop.f32.mrf.mxu1 }
 0x3ac   :  { %v2677_v42 = vpop.f32.mrf.mxu1 }
 0x3ad   :  { %v2678_v63 = vadd.f32 %v2677_v42, %v2676_v33 }
 0x3af   :  { %v2315_v53 = vadd.f32 %v2678_v63, %v2245_v49 }
 0x3b1   :  { %2319 = vst.msk [vmem:[#allocation3] sm:$0x1] %vm2318_vm2, %v2315_v53 }
 0x3b2   :  { %2802 = shalt.err (!%p2799_p4)
}
 0x3b3   :  { %2329 = dma.vmem_to_hbm [thread:$0]  %s2327_s21, 16, %s4965_s6, [#allocation4]  }
 0x3b4   :  { %2811 = dma.done.wait [#allocation4], 16  }
 0x3b5   :  { %2812 = vsyncadd [#allocation4], 4294967280 }
 0x3b6   :  { %2333 = vsyncpa [#allocation4], 1 }

</bundles_post_ra>
